<compile_context>
chip_gen: v7x
topology: tpu7x:2x2x1
jax: 0.10.0
libtpu: 0.0.40
codegen_flags: <defaults>
</compile_context>

<pallas_src>
import functools
import math

import jax
import jax.numpy as jnp
from jax.experimental import pallas as pl
from jax.experimental.pallas import tpu as pltpu

H1, H2 = 500, 300            # nn.Linear widths from the PyTorch module
H1_PAD, H2_PAD = 512, 384    # lane-dense (multiple-of-128) padded widths
LANE = 128


def _round_up(v, m):
    return ((v + m - 1) // m) * m


# --------------------------------------------------------------------------
# Kernel: one batch tile through the whole network.
# --------------------------------------------------------------------------
def _sae_kernel(*refs, training):
    if training:
        (x_ref, mask_ref,
         w1_ref, b1_ref, w2_ref, b2_ref, w3_ref, b3_ref,
         w4_ref, b4_ref, wf_ref, bf_ref,
         y_ref, xrec_ref, z_ref) = refs
    else:
        (x_ref,
         w1_ref, b1_ref, w2_ref, b2_ref, w3_ref, b3_ref,
         w4_ref, b4_ref, wf_ref, bf_ref,
         y_ref, xrec_ref, z_ref) = refs
        mask_ref = None

    bf16 = jnp.bfloat16
    x = x_ref[...].astype(bf16)

    # encoder: relu(enc1(x)) -> relu(enc2(.))
    h1 = jnp.maximum(
        jnp.dot(x, w1_ref[...], preferred_element_type=jnp.float32) + b1_ref[...],
        0.0)
    y = jnp.maximum(
        jnp.dot(h1.astype(bf16), w2_ref[...],
                preferred_element_type=jnp.float32) + b2_ref[...],
        0.0)
    y_ref[...] = y  # f32 latent (padded to 384 lanes; sliced to 300 outside)

    y_bf = y.astype(bf16)  # cast once, reuse for decoder + classifier head

    # decoder: relu(dec1(y)) -> dec2(.)
    d1 = jnp.maximum(
        jnp.dot(y_bf, w3_ref[...], preferred_element_type=jnp.float32)
        + b3_ref[...],
        0.0)
    xrec_ref[...] = (
        jnp.dot(d1.astype(bf16), w4_ref[...],
                preferred_element_type=jnp.float32) + b4_ref[...])

    # classifier head: fc1(dropout(y)); mask is pre-scaled {0, 2} in bf16.
    z_in = y_bf * mask_ref[...] if training else y_bf
    z_ref[...] = (
        jnp.dot(z_in, wf_ref[...], preferred_element_type=jnp.float32)
        + bf_ref[...])


# --------------------------------------------------------------------------
# Parameter construction / preparation.
# --------------------------------------------------------------------------
def init_params(key, n_input, n_output):
    """nn.Linear-style init: U(-1/sqrt(fan_in), 1/sqrt(fan_in)); W stored (in, out)."""
    def linear(k, fan_in, fan_out):
        kw, kb = jax.random.split(k)
        bound = 1.0 / math.sqrt(fan_in)
        w = jax.random.uniform(kw, (fan_in, fan_out), jnp.float32, -bound, bound)
        b = jax.random.uniform(kb, (1, fan_out), jnp.float32, -bound, bound)
        return w, b

    k1, k2, k3, k4, k5 = jax.random.split(key, 5)
    w1, b1 = linear(k1, n_input, H1)   # encoder1
    w2, b2 = linear(k2, H1, H2)        # encoder2
    w3, b3 = linear(k3, H2, H1)        # decoder1
    w4, b4 = linear(k4, H1, n_input)   # decoder2
    wf, bf = linear(k5, H2, n_output)  # fc1
    return dict(w1=w1, b1=b1, w2=w2, b2=b2, w3=w3, b3=b3,
                w4=w4, b4=b4, wf=wf, bf=bf)


def prepare_params(params):
    """Zero-pad all widths to lane-dense multiples of 128; weights -> bf16."""
    n_input = params["w1"].shape[0]
    n_output = params["wf"].shape[1]
    n_in_pad = _round_up(n_input, LANE)
    n_out_pad = _round_up(n_output, LANE)

    def pad_w(w, rows, cols):
        r, c = w.shape
        return jnp.pad(w, ((0, rows - r), (0, cols - c))).astype(jnp.bfloat16)

    def pad_b(b, cols):
        return jnp.pad(b, ((0, 0), (0, cols - b.shape[1]))).astype(jnp.float32)

    return dict(
        w1=pad_w(params["w1"], n_in_pad, H1_PAD), b1=pad_b(params["b1"], H1_PAD),
        w2=pad_w(params["w2"], H1_PAD, H2_PAD),   b2=pad_b(params["b2"], H2_PAD),
        w3=pad_w(params["w3"], H2_PAD, H1_PAD),   b3=pad_b(params["b3"], H1_PAD),
        w4=pad_w(params["w4"], H1_PAD, n_in_pad), b4=pad_b(params["b4"], n_in_pad),
        wf=pad_w(params["wf"], H2_PAD, n_out_pad), bf=pad_b(params["bf"], n_out_pad),
        _n_input=n_input, _n_output=n_output,
    )


# --------------------------------------------------------------------------
# Wrapper: batch tiling + pallas_call.
# --------------------------------------------------------------------------
def sparse_autoencoder_forward(x, pp, *, training=True, rng=None, tile_b=512):
    B, n_input = x.shape
    assert n_input == pp["_n_input"]
    n_output = pp["_n_output"]
    n_in_pad = pp["w4"].shape[1]
    n_out_pad = pp["wf"].shape[1]

    # ---- batch tile selection (multiple of 8, big to amortize grid overhead,
    #      but keep >=2 grid steps when possible so v7x can use both cores) ----
    tile_b = max(8, min(_round_up(tile_b, 8), _round_up(B, 8)))
    b_pad = _round_up(B, tile_b)
    if b_pad // tile_b == 1 and tile_b >= 16:
        tile_b = max(8, _round_up(tile_b // 2, 8))
        b_pad = _round_up(B, tile_b)
    grid = (b_pad // tile_b,)

    # ---- pad batch rows and feature lanes (zeros; sliced off at the end) ----
    xp = jnp.pad(x, ((0, b_pad - B), (0, n_in_pad - n_input)))

    # ---- dropout(0.5) keep-mask, pre-scaled by 1/(1-p)=2, stored as bf16 ----
    if training:
        if rng is None:
            rng = jax.random.PRNGKey(0)
        keep = jax.random.bernoulli(rng, 0.5, (b_pad, H2_PAD))
        mask = jnp.where(keep, 2.0, 0.0).astype(jnp.bfloat16)
        mask_bytes = int(mask.size) * 2
    else:
        mask = None
        mask_bytes = 0

    # ---- BlockSpecs ----
    def tile_spec(last_dim):
        return pl.BlockSpec((tile_b, last_dim), lambda i: (i, 0))

    def resident_spec(a):  # same block every grid step -> DMA'd once, stays in VMEM
        return pl.BlockSpec(a.shape, lambda i: (0, 0))

    weight_keys = ("w1", "b1", "w2", "b2", "w3", "b3", "w4", "b4", "wf", "bf")
    weights = [pp[k] for k in weight_keys]
    weight_specs = [resident_spec(w) for w in weights]

    if training:
        in_specs = [tile_spec(n_in_pad), tile_spec(H2_PAD)] + weight_specs
        inputs = [xp, mask] + weights
    else:
        in_specs = [tile_spec(n_in_pad)] + weight_specs
        inputs = [xp] + weights

    out_specs = (tile_spec(H2_PAD), tile_spec(n_in_pad), tile_spec(n_out_pad))
    out_shapes = (
        jax.ShapeDtypeStruct((b_pad, H2_PAD), jnp.float32),    # y (padded latent)
        jax.ShapeDtypeStruct((b_pad, n_in_pad), jnp.float32),  # x reconstruction
        jax.ShapeDtypeStruct((b_pad, n_out_pad), jnp.float32),  # z logits
    )

    # ---- advisory cost estimate for the XLA scheduler ----
    flops = 2 * b_pad * (n_in_pad * H1_PAD + H1_PAD * H2_PAD + H2_PAD * H1_PAD
                         + H1_PAD * n_in_pad + H2_PAD * n_out_pad)
    bytes_accessed = (
        int(xp.size) * 4
        + mask_bytes
        + sum(int(w.size) * w.dtype.itemsize for w in weights)
        + b_pad * (H2_PAD + n_in_pad + n_out_pad) * 4)

    y_pad, xrec, z = pl.pallas_call(
        functools.partial(_sae_kernel, training=training),
        grid=grid,
        in_specs=in_specs,
        out_specs=out_specs,
        out_shape=out_shapes,
        compiler_params=pltpu.CompilerParams(
            dimension_semantics=("parallel",),
            vmem_limit_bytes=32 * 1024 * 1024),
        cost_estimate=pl.CostEstimate(
            flops=flops, transcendentals=0, bytes_accessed=bytes_accessed),
    )(*inputs)

    # Strip batch / lane padding at the API boundary.
    return y_pad[:B, :H2], xrec[:B, :n_input], z[:B, :n_output]


# --------------------------------------------------------------------------
# Pure-JAX eval-mode reference (same bf16-input / f32-accum matmul recipe).
# --------------------------------------------------------------------------
def _reference_eval(x, p):
    bf = jnp.bfloat16

    def lin(a, w, b):
        return jnp.dot(a.astype(bf), w.astype(bf),
                       preferred_element_type=jnp.float32) + b

    h1 = jnp.maximum(lin(x, p["w1"], p["b1"]), 0.0)
    y = jnp.maximum(lin(h1, p["w2"], p["b2"]), 0.0)
    d1 = jnp.maximum(lin(y, p["w3"], p["b3"]), 0.0)
    xrec = lin(d1, p["w4"], p["b4"])
    z = lin(y, p["wf"], p["bf"])  # dropout = identity in eval
    return y, xrec, z


if __name__ == "__main__":
    B, n_input, n_output = 64, 64, 16

    key = jax.random.PRNGKey(0)
    kx, kp, kd = jax.random.split(key, 3)
    x = jax.random.normal(kx, (B, n_input), dtype=jnp.float32)
    params = init_params(kp, n_input, n_output)
    pp = prepare_params(params)

    # Training-mode forward (dropout active, mask deterministic given kd).
    y_t, xrec_t, z_t = sparse_autoencoder_forward(x, pp, training=True, rng=kd)
    jax.block_until_ready((y_t, xrec_t, z_t))

    # Eval-mode forward, checked against the pure-JAX reference.
    y_e, xrec_e, z_e = sparse_autoencoder_forward(x, pp, training=False)
    jax.block_until_ready((y_e, xrec_e, z_e))
    y_r, xrec_r, z_r = _reference_eval(x, params)

    assert y_t.shape == (B, H2)
    assert xrec_t.shape == (B, n_input)
    assert z_t.shape == (B, n_output)
    assert bool(jnp.all(jnp.isfinite(y_t)))
    assert bool(jnp.all(jnp.isfinite(xrec_t)))
    assert bool(jnp.all(jnp.isfinite(z_t)))
    assert jnp.allclose(y_e, y_r, atol=2e-2, rtol=2e-2)
    assert jnp.allclose(xrec_e, xrec_r, atol=2e-2, rtol=2e-2)
    assert jnp.allclose(z_e, z_r, atol=2e-2, rtol=2e-2)

    print("KERNEL_OK")
</pallas_src>

<mosaic_0001>
module attributes {stable_mosaic.version = 11 : i64} {
  func.func @_sae_kernel(%arg0: i32, %arg1: memref<32x128xf32, #tpu.memory_space<vmem>>, %arg2: memref<32x384xbf16, #tpu.memory_space<vmem>>, %arg3: memref<128x512xbf16, #tpu.memory_space<vmem>>, %arg4: memref<1x512xf32, #tpu.memory_space<vmem>>, %arg5: memref<512x384xbf16, #tpu.memory_space<vmem>>, %arg6: memref<1x384xf32, #tpu.memory_space<vmem>>, %arg7: memref<384x512xbf16, #tpu.memory_space<vmem>>, %arg8: memref<1x512xf32, #tpu.memory_space<vmem>>, %arg9: memref<512x128xbf16, #tpu.memory_space<vmem>>, %arg10: memref<1x128xf32, #tpu.memory_space<vmem>>, %arg11: memref<384x128xbf16, #tpu.memory_space<vmem>>, %arg12: memref<1x128xf32, #tpu.memory_space<vmem>>, %arg13: memref<32x384xf32, #tpu.memory_space<vmem>>, %arg14: memref<32x128xf32, #tpu.memory_space<vmem>>, %arg15: memref<32x128xf32, #tpu.memory_space<vmem>>) attributes {dimension_semantics = [#tpu.dimension_semantics<parallel>], iteration_bounds = array<i64: 2>, scalar_prefetch = 0 : i64, scratch_operands = 0 : i64, tpu.core_type = #tpu.core_type<tc>, window_params = [{transform_indices = @transform_0, window_bounds = array<i64: 32, 128>}, {transform_indices = @transform_1, window_bounds = array<i64: 32, 384>}, {pipeline_mode = #tpu.pipeline_mode<synchronous>, transform_indices = @transform_2, window_bounds = array<i64: 128, 512>}, {pipeline_mode = #tpu.pipeline_mode<synchronous>, transform_indices = @transform_3, window_bounds = array<i64: 1, 512>}, {pipeline_mode = #tpu.pipeline_mode<synchronous>, transform_indices = @transform_4, window_bounds = array<i64: 512, 384>}, {pipeline_mode = #tpu.pipeline_mode<synchronous>, transform_indices = @transform_5, window_bounds = array<i64: 1, 384>}, {pipeline_mode = #tpu.pipeline_mode<synchronous>, transform_indices = @transform_6, window_bounds = array<i64: 384, 512>}, {pipeline_mode = #tpu.pipeline_mode<synchronous>, transform_indices = @transform_7, window_bounds = array<i64: 1, 512>}, {pipeline_mode = #tpu.pipeline_mode<synchronous>, transform_indices = @transform_8, window_bounds = array<i64: 512, 128>}, {pipeline_mode = #tpu.pipeline_mode<synchronous>, transform_indices = @transform_9, window_bounds = array<i64: 1, 128>}, {pipeline_mode = #tpu.pipeline_mode<synchronous>, transform_indices = @transform_10, window_bounds = array<i64: 384, 128>}, {pipeline_mode = #tpu.pipeline_mode<synchronous>, transform_indices = @transform_11, window_bounds = array<i64: 1, 128>}, {transform_indices = @transform_12, window_bounds = array<i64: 32, 384>}, {transform_indices = @transform_13, window_bounds = array<i64: 32, 128>}, {transform_indices = @transform_14, window_bounds = array<i64: 32, 128>}]} {
    %c0 = arith.constant 0 : index
    %c0_0 = arith.constant 0 : index
    %0 = vector.load %arg1[%c0, %c0_0] : memref<32x128xf32, #tpu.memory_space<vmem>>, vector<32x128xf32>
    %1 = arith.truncf %0 : vector<32x128xf32> to vector<32x128xbf16>
    %c0_1 = arith.constant 0 : index
    %c0_2 = arith.constant 0 : index
    %2 = vector.load %arg3[%c0_1, %c0_2] : memref<128x512xbf16, #tpu.memory_space<vmem>>, vector<128x512xbf16>
    %cst = arith.constant dense<0.000000e+00> : vector<32x512xf32>
    %3 = tpu.matmul %1, %2, %cst {dimension_numbers = #tpu.dot_dimension_numbers<[1], [0], [0], [1], [0, 0, 1, 1], [], []>} : vector<32x128xbf16>, vector<128x512xbf16>, vector<32x512xf32> -> vector<32x512xf32>
    %c0_3 = arith.constant 0 : index
    %c0_4 = arith.constant 0 : index
    %4 = vector.load %arg4[%c0_3, %c0_4] : memref<1x512xf32, #tpu.memory_space<vmem>>, vector<1x512xf32>
    %5 = vector.broadcast %4 : vector<1x512xf32> to vector<32x512xf32>
    %6 = arith.addf %3, %5 : vector<32x512xf32>
    %cst_5 = arith.constant 0.000000e+00 : f32
    %7 = vector.broadcast %cst_5 : f32 to vector<32x512xf32>
    %8 = arith.maximumf %6, %7 : vector<32x512xf32>
    %9 = arith.truncf %8 : vector<32x512xf32> to vector<32x512xbf16>
    %c0_6 = arith.constant 0 : index
    %c0_7 = arith.constant 0 : index
    %10 = vector.load %arg5[%c0_6, %c0_7] : memref<512x384xbf16, #tpu.memory_space<vmem>>, vector<512x384xbf16>
    %cst_8 = arith.constant dense<0.000000e+00> : vector<32x384xf32>
    %11 = tpu.matmul %9, %10, %cst_8 {dimension_numbers = #tpu.dot_dimension_numbers<[1], [0], [0], [1], [0, 0, 1, 1], [], []>} : vector<32x512xbf16>, vector<512x384xbf16>, vector<32x384xf32> -> vector<32x384xf32>
    %c0_9 = arith.constant 0 : index
    %c0_10 = arith.constant 0 : index
    %12 = vector.load %arg6[%c0_9, %c0_10] : memref<1x384xf32, #tpu.memory_space<vmem>>, vector<1x384xf32>
    %13 = vector.broadcast %12 : vector<1x384xf32> to vector<32x384xf32>
    %14 = arith.addf %11, %13 : vector<32x384xf32>
    %cst_11 = arith.constant 0.000000e+00 : f32
    %15 = vector.broadcast %cst_11 : f32 to vector<32x384xf32>
    %16 = arith.maximumf %14, %15 : vector<32x384xf32>
    %c0_12 = arith.constant 0 : index
    %c0_13 = arith.constant 0 : index
    %17 = vector.load %arg13[%c0_12, %c0_13] : memref<32x384xf32, #tpu.memory_space<vmem>>, vector<32x384xf32>
    tpu.vector_store %arg13[%c0_12, %c0_13], %16 {strides = array<i32>} : memref<32x384xf32, #tpu.memory_space<vmem>>, vector<32x384xf32>,
    %18 = arith.truncf %16 : vector<32x384xf32> to vector<32x384xbf16>
    %c0_14 = arith.constant 0 : index
    %c0_15 = arith.constant 0 : index
    %19 = vector.load %arg7[%c0_14, %c0_15] : memref<384x512xbf16, #tpu.memory_space<vmem>>, vector<384x512xbf16>
    %cst_16 = arith.constant dense<0.000000e+00> : vector<32x512xf32>
    %20 = tpu.matmul %18, %19, %cst_16 {dimension_numbers = #tpu.dot_dimension_numbers<[1], [0], [0], [1], [0, 0, 1, 1], [], []>} : vector<32x384xbf16>, vector<384x512xbf16>, vector<32x512xf32> -> vector<32x512xf32>
    %c0_17 = arith.constant 0 : index
    %c0_18 = arith.constant 0 : index
    %21 = vector.load %arg8[%c0_17, %c0_18] : memref<1x512xf32, #tpu.memory_space<vmem>>, vector<1x512xf32>
    %22 = vector.broadcast %21 : vector<1x512xf32> to vector<32x512xf32>
    %23 = arith.addf %20, %22 : vector<32x512xf32>
    %cst_19 = arith.constant 0.000000e+00 : f32
    %24 = vector.broadcast %cst_19 : f32 to vector<32x512xf32>
    %25 = arith.maximumf %23, %24 : vector<32x512xf32>
    %26 = arith.truncf %25 : vector<32x512xf32> to vector<32x512xbf16>
    %c0_20 = arith.constant 0 : index
    %c0_21 = arith.constant 0 : index
    %27 = vector.load %arg9[%c0_20, %c0_21] : memref<512x128xbf16, #tpu.memory_space<vmem>>, vector<512x128xbf16>
    %cst_22 = arith.constant dense<0.000000e+00> : vector<32x128xf32>
    %28 = tpu.matmul %26, %27, %cst_22 {dimension_numbers = #tpu.dot_dimension_numbers<[1], [0], [0], [1], [0, 0, 1, 1], [], []>} : vector<32x512xbf16>, vector<512x128xbf16>, vector<32x128xf32> -> vector<32x128xf32>
    %c0_23 = arith.constant 0 : index
    %c0_24 = arith.constant 0 : index
    %29 = vector.load %arg10[%c0_23, %c0_24] : memref<1x128xf32, #tpu.memory_space<vmem>>, vector<1x128xf32>
    %30 = vector.broadcast %29 : vector<1x128xf32> to vector<32x128xf32>
    %31 = arith.addf %28, %30 : vector<32x128xf32>
    %c0_25 = arith.constant 0 : index
    %c0_26 = arith.constant 0 : index
    %32 = vector.load %arg14[%c0_25, %c0_26] : memref<32x128xf32, #tpu.memory_space<vmem>>, vector<32x128xf32>
    tpu.vector_store %arg14[%c0_25, %c0_26], %31 {strides = array<i32>} : memref<32x128xf32, #tpu.memory_space<vmem>>, vector<32x128xf32>,
    %c0_27 = arith.constant 0 : index
    %c0_28 = arith.constant 0 : index
    %33 = vector.load %arg2[%c0_27, %c0_28] : memref<32x384xbf16, #tpu.memory_space<vmem>>, vector<32x384xbf16>
    %34 = arith.mulf %18, %33 : vector<32x384xbf16>
    %c0_29 = arith.constant 0 : index
    %c0_30 = arith.constant 0 : index
    %35 = vector.load %arg11[%c0_29, %c0_30] : memref<384x128xbf16, #tpu.memory_space<vmem>>, vector<384x128xbf16>
    %cst_31 = arith.constant dense<0.000000e+00> : vector<32x128xf32>
    %36 = tpu.matmul %34, %35, %cst_31 {dimension_numbers = #tpu.dot_dimension_numbers<[1], [0], [0], [1], [0, 0, 1, 1], [], []>} : vector<32x384xbf16>, vector<384x128xbf16>, vector<32x128xf32> -> vector<32x128xf32>
    %c0_32 = arith.constant 0 : index
    %c0_33 = arith.constant 0 : index
    %37 = vector.load %arg12[%c0_32, %c0_33] : memref<1x128xf32, #tpu.memory_space<vmem>>, vector<1x128xf32>
    %38 = vector.broadcast %37 : vector<1x128xf32> to vector<32x128xf32>
    %39 = arith.addf %36, %38 : vector<32x128xf32>
    %c0_34 = arith.constant 0 : index
    %c0_35 = arith.constant 0 : index
    %40 = vector.load %arg15[%c0_34, %c0_35] : memref<32x128xf32, #tpu.memory_space<vmem>>, vector<32x128xf32>
    tpu.vector_store %arg15[%c0_34, %c0_35], %39 {strides = array<i32>} : memref<32x128xf32, #tpu.memory_space<vmem>>, vector<32x128xf32>,
    return
  }
  func.func @transform_0(%arg0: i32) -> (i32, i32) {
    %c0_i32 = arith.constant 0 : i32
    %c0_i32_0 = arith.constant 0 : i32
    return %arg0, %c0_i32 : i32, i32
  }
  func.func @transform_1(%arg0: i32) -> (i32, i32) {
    %c0_i32 = arith.constant 0 : i32
    %c0_i32_0 = arith.constant 0 : i32
    return %arg0, %c0_i32 : i32, i32
  }
  func.func @transform_2(%arg0: i32) -> (i32, i32) {
    %c0_i32 = arith.constant 0 : i32
    %c0_i32_0 = arith.constant 0 : i32
    %c0_i32_1 = arith.constant 0 : i32
    return %c0_i32, %c0_i32_0 : i32, i32
  }
  func.func @transform_3(%arg0: i32) -> (i32, i32) {
    %c0_i32 = arith.constant 0 : i32
    %c0_i32_0 = arith.constant 0 : i32
    %c0_i32_1 = arith.constant 0 : i32
    return %c0_i32, %c0_i32_0 : i32, i32
  }
  func.func @transform_4(%arg0: i32) -> (i32, i32) {
    %c0_i32 = arith.constant 0 : i32
    %c0_i32_0 = arith.constant 0 : i32
    %c0_i32_1 = arith.constant 0 : i32
    return %c0_i32, %c0_i32_0 : i32, i32
  }
  func.func @transform_5(%arg0: i32) -> (i32, i32) {
    %c0_i32 = arith.constant 0 : i32
    %c0_i32_0 = arith.constant 0 : i32
    %c0_i32_1 = arith.constant 0 : i32
    return %c0_i32, %c0_i32_0 : i32, i32
  }
  func.func @transform_6(%arg0: i32) -> (i32, i32) {
    %c0_i32 = arith.constant 0 : i32
    %c0_i32_0 = arith.constant 0 : i32
    %c0_i32_1 = arith.constant 0 : i32
    return %c0_i32, %c0_i32_0 : i32, i32
  }
  func.func @transform_7(%arg0: i32) -> (i32, i32) {
    %c0_i32 = arith.constant 0 : i32
    %c0_i32_0 = arith.constant 0 : i32
    %c0_i32_1 = arith.constant 0 : i32
    return %c0_i32, %c0_i32_0 : i32, i32
  }
  func.func @transform_8(%arg0: i32) -> (i32, i32) {
    %c0_i32 = arith.constant 0 : i32
    %c0_i32_0 = arith.constant 0 : i32
    %c0_i32_1 = arith.constant 0 : i32
    return %c0_i32, %c0_i32_0 : i32, i32
  }
  func.func @transform_9(%arg0: i32) -> (i32, i32) {
    %c0_i32 = arith.constant 0 : i32
    %c0_i32_0 = arith.constant 0 : i32
    %c0_i32_1 = arith.constant 0 : i32
    return %c0_i32, %c0_i32_0 : i32, i32
  }
  func.func @transform_10(%arg0: i32) -> (i32, i32) {
    %c0_i32 = arith.constant 0 : i32
    %c0_i32_0 = arith.constant 0 : i32
    %c0_i32_1 = arith.constant 0 : i32
    return %c0_i32, %c0_i32_0 : i32, i32
  }
  func.func @transform_11(%arg0: i32) -> (i32, i32) {
    %c0_i32 = arith.constant 0 : i32
    %c0_i32_0 = arith.constant 0 : i32
    %c0_i32_1 = arith.constant 0 : i32
    return %c0_i32, %c0_i32_0 : i32, i32
  }
  func.func @transform_12(%arg0: i32) -> (i32, i32) {
    %c0_i32 = arith.constant 0 : i32
    %c0_i32_0 = arith.constant 0 : i32
    return %arg0, %c0_i32 : i32, i32
  }
  func.func @transform_13(%arg0: i32) -> (i32, i32) {
    %c0_i32 = arith.constant 0 : i32
    %c0_i32_0 = arith.constant 0 : i32
    return %arg0, %c0_i32 : i32, i32
  }
  func.func @transform_14(%arg0: i32) -> (i32, i32) {
    %c0_i32 = arith.constant 0 : i32
    %c0_i32_0 = arith.constant 0 : i32
    return %arg0, %c0_i32 : i32, i32
  }
}

</mosaic_0001>

<bundles_post_ra>
// kernel: tpu_custom_call.1
= control target key start
LH: loop header
LB: loop body
LE: loop exit
PB: predicated region body
PF: predicated region fallthrough
CT: control target
= control target key end

     0   :  { %s5753_s0 = inlined_call_operand.hbm [shape: f32[64,128], index: 0, kind: input, shape index: {}]   ;;  %s5754_s1 = inlined_call_operand.hbm [shape: bf16[64,384], index: 1, kind: input, shape index: {}]   ;;  %s5755_s2 = inlined_call_operand.hbm [shape: bf16[128,512], index: 2, kind: input, shape index: {}]   ;;  %s5756_s3 = inlined_call_operand.vmem [shape: f32[1,512], index: 3, kind: input, shape index: {}]   ;;  %s5757_s4 = inlined_call_operand.hbm [shape: bf16[512,384], index: 4, kind: input, shape index: {}]   ;;  %s5758_s5 = inlined_call_operand.vmem [shape: f32[1,384], index: 5, kind: input, shape index: {}]   ;;  %s5759_s6 = inlined_call_operand.hbm [shape: bf16[384,512], index: 6, kind: input, shape index: {}]   ;;  %s5760_s7 = inlined_call_operand.vmem [shape: f32[1,512], index: 7, kind: input, shape index: {}]   ;;  %s5761_s8 = inlined_call_operand.hbm [shape: bf16[512,128], index: 8, kind: input, shape index: {}]   ;;  %s5762_s9 = inlined_call_operand.vmem [shape: f32[1,128], index: 9, kind: input, shape index: {}]   ;;  %s5763_s10 = inlined_call_operand.hbm [shape: bf16[384,128], index: 10, kind: input, shape index: {}]   ;;  %s5764_s11 = inlined_call_operand.vmem [shape: f32[1,128], index: 11, kind: input, shape index: {}]   ;;  %s5765_s12 = inlined_call_operand.hbm [shape: f32[64,384], index: 12, kind: output, shape index: {0}]   ;;  %s5766_s13 = inlined_call_operand.hbm [shape: f32[64,128], index: 13, kind: output, shape index: {1}]   ;;  %s5767_s14 = inlined_call_operand.hbm [shape: f32[64,128], index: 14, kind: output, shape index: {2}]  }
   0x1   :  { %5779 = sst [smem:[#allocation25_spill]] %s5753_s0 }
   0x2   :  { %5780 = sst [smem:[#allocation26_spill]] %s5755_s2 }
   0x3   :  { %5781 = sst [smem:[#allocation27_spill]] %s5757_s4 }
   0x4   :  { %5782 = sst [smem:[#allocation28_spill]] %s5759_s6 }
   0x5   :  { %5783 = sst [smem:[#allocation29_spill]] %s5760_s7 }
   0x6   :  { %5784 = sst [smem:[#allocation30_spill]] %s5761_s8 }
   0x7   :  { %5785 = sst [smem:[#allocation31_spill]] %s5762_s9 }
   0x8   :  { %5786 = sst [smem:[#allocation32_spill]] %s5763_s10 }
   0x9   :  { %5787 = sst [smem:[#allocation33_spill]] %s5764_s11 }
   0xa   :  { %5788 = sst [smem:[#allocation34_spill]] %s5765_s12 }
   0xb   :  { %5789 = sst [smem:[#allocation35_spill]] %s5766_s13 }
   0xc   :  { %5790 = sst [smem:[#allocation36_spill]] %s5767_s14 }
   0xd   :  { %20 = vsyncpa [#allocation3], 0 }
   0xe   :  { %22 = vsyncpa [#allocation3 + $0x1], 0 }
   0xf   :  { %23 = vsyncpa [#allocation6], 0 }
  0x10   :  { %25 = vsyncpa [#allocation6 + $0x1], 0 }
  0x11   :  { %26 = vsyncpa [#allocation9], 0 }
  0x12   :  { %27 = vsyncpa [#allocation12], 0 }
  0x13   :  { %28 = vsyncpa [#allocation4], 0 }
  0x14   :  { %30 = vsyncpa [#allocation4 + $0x1], 0 }
  0x15   :  { %31 = vsyncpa [#allocation16], 0 }
  0x16   :  { %33 = vsyncpa [#allocation16 + $0x1], 0  ;;  %s5170_s29 = smov 0   ;;  %s5172_s30 = smov 0  }
  0x17   :  { %s5174_s15 = smov 0   ;;  %s5176_s16 = smov 0  }
  0x18 LB: > { %s5072_s17 = smov [#allocation7]   ;;  %s5191_s19 = sadd.s32 4294967295, %s5070_s16   ;;  %s5070_s16 = sphi %s5176_s16, %s5829_s16   ;;  %s5066_s15 = sphi %s5174_s15, %s5828_s15   ;;  %s5062_s30 = sphi %s5172_s30, %s5827_s30   ;;  %s5058_s29 = sphi %s5170_s29, %s5826_s29  }
  0x19   : > { %s396_s18 = sshll.u32 %s5072_s17, 4  ;;  %p3672_p0 = scmp.ge.s32.totalorder %s5070_s16, 1  ;;  %s5196_s18 = int_to_ptr.vmem [resolvable:$true] %s396_s18 }
  0x1a   : > { %p5772_p1 = scmp.eq.s32.totalorder %s5191_s19, 0  ;;  %p384_p2 = scmp.lt.s32.totalorder %s5070_s16, 3 }
  0x1b   : > { %s5073_s21 = smov [#allocation8]   ;;  %s5074_s24 = smov [#allocation11]  }
  0x1c   : > { %p5198_p3 = pnand %p3672_p0, %p384_p2  ;;  %s412_s22 = sshll.u32 %s5073_s21, 4  ;;  %s5211_s22 = int_to_ptr.vmem [resolvable:$true] %s412_s22 }
  0x1d   : > { %s5213_s25 = sshll.u32 %s5074_s24, 4  ;;  %s5793_s2 = sld [smem:[#allocation26_spill]]  ;;  %s445_s25 = int_to_ptr.vmem [resolvable:$true] %s5213_s25 }
  0x1e   : > { %s5791_s20 = scalar_select %p5198_p3, 1, 0 }
  0x1f   : > { %p4249_p5 = pneg %p5198_p3 }
  0x21   : > { %p5207_p6 = pnand %p4249_p5, %p5772_p1 }
  0x23   : > { %s4728_s28 = scalar_lea.hbm %s5793_s2, 4096  ;;  %p5223_p8 = pneg %p5207_p6 }
  0x24   : > { %p4729_p7 = scmp.ne.s32.totalorder %s5793_s2, %s4728_s28  ;;  %p4735_p11 = scmp.lt.u32.totalorder %s4728_s28, %s5793_s2 }
  0x26   : > { %p4731_p9 = pnand %p5223_p8, %p4729_p7 }
  0x28   : > { %p4732_p10 = pneg %p4731_p9 }
  0x2a   : > { %p4737_p12 = pnand %p4735_p11, %p4732_p10 }
  0x2c   : > { %4740 = shalt.err (!%p4737_p12)
}
  0x2d   : > { %s4741_s14 = scalar_lea.vmem %s5196_s18, 4096  ;;  %p4749_p5 = scmp.lt.s32.totalorder %s5196_s18, %s5196_s18 }
  0x2e   : > { %p4742_p13 = scmp.ne.s32.totalorder %s5196_s18, %s4741_s14  ;;  %p4750_p4 = scmp.lt.s32.totalorder %s4741_s14, %s4741_s14 }
  0x30   : > { %p4744_p0 = pnand %p4742_p13, %p5223_p8  ;;  %p4751_p7 = por %p4750_p4, %p4749_p5 }
  0x32   : > { %p4745_p2 = pneg %p4744_p0 }
  0x34   : > { %p4752_p9 = pnand %p4751_p7, %p4745_p2 }
  0x36   : > { %4755 = shalt.err (!%p4752_p9)
}
  0x37   : > { %s5771_s26 = smov 256   ;;  %s5776_s11 = smov 16  }
  0x38   : > { %4252 = dma.hbm_to_vmem [thread:$0]  (!%p5207_p6), %s5793_s2, 4096, %s5196_s18, [#allocation6], %s5771_s26, %s5771_s26, %s5776_s11  }
  0x39   : > { %s5795_s4 = sld [smem:[#allocation27_spill]] }
  0x3f   : > { %s4756_s14 = scalar_lea.hbm %s5795_s4, 12288 }
  0x40   : > { %p4757_p4 = scmp.ne.s32.totalorder %s5795_s4, %s4756_s14  ;;  %p4763_p12 = scmp.lt.u32.totalorder %s4756_s14, %s5795_s4 }
  0x42   : > { %p4759_p10 = pnand %p4757_p4, %p5223_p8 }
  0x44   : > { %p4760_p11 = pneg %p4759_p10 }
  0x46   : > { %p4765_p13 = pnand %p4763_p12, %p4760_p11 }
  0x48   : > { %4768 = shalt.err (!%p4765_p13)
}
  0x49   : > { %s4769_s18 = scalar_lea.vmem %s5211_s22, 12288  ;;  %p4777_p7 = scmp.lt.s32.totalorder %s5211_s22, %s5211_s22 }
  0x4a   : > { %p4770_p0 = scmp.ne.s32.totalorder %s5211_s22, %s4769_s18  ;;  %p4778_p9 = scmp.lt.s32.totalorder %s4769_s18, %s4769_s18 }
  0x4c   : > { %p4772_p2 = pnand %p4770_p0, %p5223_p8  ;;  %p4779_p4 = por %p4778_p9, %p4777_p7 }
  0x4e   : > { %p4773_p5 = pneg %p4772_p2 }
  0x50   : > { %p4780_p10 = pnand %p4779_p4, %p4773_p5 }
  0x52   : > { %4783 = shalt.err (!%p4780_p10)
}
  0x53   : > { %s5774_s9 = smov 192   ;;  %s5775_s7 = smov 12  }
  0x54   : > { %4255 = dma.hbm_to_vmem [thread:$0]  (!%p5207_p6), %s5795_s4, 12288, %s5211_s22, [#allocation9], %s5774_s9, %s5774_s9, %s5775_s7  }
  0x55   : > { %s5796_s8 = sld [smem:[#allocation30_spill]] }
  0x5b   : > { %s4784_s17 = scalar_lea.hbm %s5796_s8, 4096 }
  0x5c   : > { %p4785_p11 = scmp.ne.s32.totalorder %s5796_s8, %s4784_s17  ;;  %p4791_p0 = scmp.lt.u32.totalorder %s4784_s17, %s5796_s8 }
  0x5e   : > { %p4787_p12 = pnand %p4785_p11, %p5223_p8 }
  0x60   : > { %p4788_p13 = pneg %p4787_p12 }
  0x62   : > { %p4793_p2 = pnand %p4791_p0, %p4788_p13 }
  0x64   : > { %4796 = shalt.err (!%p4793_p2)
}
  0x65   : > { %s4797_s12 = scalar_lea.vmem %s445_s25, 4096  ;;  %p4805_p4 = scmp.lt.s32.totalorder %s445_s25, %s445_s25 }
  0x66   : > { %p4798_p5 = scmp.ne.s32.totalorder %s445_s25, %s4797_s12  ;;  %p4806_p10 = scmp.lt.s32.totalorder %s4797_s12, %s4797_s12 }
  0x68   : > { %p4800_p7 = pnand %p4798_p5, %p5223_p8  ;;  %p4807_p1 = por %p4806_p10, %p4805_p4 }
  0x6a   : > { %p4801_p9 = pneg %p4800_p7 }
  0x6c   : > { %p4808_p3 = pnand %p4807_p1, %p4801_p9 }
  0x6e   : > { %4811 = shalt.err (!%p4808_p3)
}
  0x6f   : > { %s5079_s22 = smov 64   ;;  %s5080_s13 = smov 4  }
  0x70   : > { %4261 = dma.hbm_to_vmem [thread:$0]  (!%p5207_p6), %s5796_s8, 4096, %s445_s25, [#allocation12], %s5079_s22, %s5079_s22, %s5080_s13  }
  0x71   : > { %s5081_s28 = smov [#allocation10]   ;;  %s5082_s24 = smov [#allocation13]  }
  0x72   : > { %s428_s17 = sshll.u32 %s5081_s28, 4  ;;  %s460_s14 = sshll.u32 %s5082_s24, 4  ;;  %s429_s17 = int_to_ptr.vmem [resolvable:$true] %s428_s17  ;;  %s461_s14 = int_to_ptr.vmem [resolvable:$true] %s460_s14 }
  0x73   : > { %s5797_s6 = sld [smem:[#allocation28_spill]] }
  0x79   : > { %s4812_s9 = scalar_lea.hbm %s5797_s6, 12288 }
  0x7a   : > { %p4813_p1 = scmp.ne.s32.totalorder %s5797_s6, %s4812_s9  ;;  %p4819_p12 = scmp.lt.u32.totalorder %s4812_s9, %s5797_s6 }
  0x7c   : > { %p4815_p3 = pnand %p4813_p1, %p5223_p8 }
  0x7e   : > { %p4816_p11 = pneg %p4815_p3 }
  0x80   : > { %p4821_p13 = pnand %p4819_p12, %p4816_p11 }
  0x82   : > { %4824 = shalt.err (!%p4821_p13)
}
  0x83   : > { %s4825_s25 = scalar_lea.vmem %s429_s17, 12288  ;;  %p4833_p7 = scmp.lt.s32.totalorder %s429_s17, %s429_s17 }
  0x84   : > { %p4826_p0 = scmp.ne.s32.totalorder %s429_s17, %s4825_s25  ;;  %p4834_p9 = scmp.lt.s32.totalorder %s4825_s25, %s4825_s25 }
  0x86   : > { %p4828_p2 = pnand %p4826_p0, %p5223_p8  ;;  %p4835_p4 = por %p4834_p9, %p4833_p7 }
  0x88   : > { %p4829_p5 = pneg %p4828_p2 }
  0x8a   : > { %p4836_p10 = pnand %p4835_p4, %p4829_p5 }
  0x8c   : > { %4839 = shalt.err (!%p4836_p10)
}
  0x8d   : > { %s5798_s11 = smov 16   ;;  %s5799_s7 = smov 256  }
  0x8e   : > { %4258 = dma.hbm_to_vmem [thread:$0]  (!%p5207_p6), %s5797_s6, 12288, %s429_s17, [#allocation9], %s5799_s7, %s5799_s7, %s5798_s11  }
  0x8f   : > { %s5800_s10 = sld [smem:[#allocation32_spill]] }
  0x95   : > { %s4840_s27 = scalar_lea.hbm %s5800_s10, 3072 }
  0x96   : > { %p4841_p1 = scmp.ne.s32.totalorder %s5800_s10, %s4840_s27  ;;  %p4847_p12 = scmp.lt.u32.totalorder %s4840_s27, %s5800_s10 }
  0x98   : > { %p4843_p3 = pnand %p4841_p1, %p5223_p8 }
  0x9a   : > { %p4844_p11 = pneg %p4843_p3 }
  0x9c   : > { %p4849_p13 = pnand %p4847_p12, %p4844_p11 }
  0x9e   : > { %4852 = shalt.err (!%p4849_p13)
}
  0x9f   : > { %s4853_s25 = scalar_lea.vmem %s461_s14, 3072  ;;  %p4861_p7 = scmp.lt.s32.totalorder %s461_s14, %s461_s14 }
  0xa0   : > { %p4854_p0 = scmp.ne.s32.totalorder %s461_s14, %s4853_s25  ;;  %p4862_p9 = scmp.lt.s32.totalorder %s4853_s25, %s4853_s25 }
  0xa2   : > { %p4856_p2 = pnand %p4854_p0, %p5223_p8  ;;  %p4863_p4 = por %p4862_p9, %p4861_p7 }
  0xa4   : > { %p4857_p5 = pneg %p4856_p2 }
  0xa6   : > { %p4864_p10 = pnand %p4863_p4, %p4857_p5 }
  0xa8   : > { %4867 = shalt.err (!%p4864_p10)
}
  0xa9   : > { %4264 = dma.hbm_to_vmem [thread:$0]  (!%p5207_p6), %s5800_s10, 3072, %s461_s14, [#allocation12], %s5079_s22, %s5079_s22, %s5080_s13  }
  0xaa   : > { %s5778_s23 = sadd.s32 4294967294, %s5070_s16   ;;  %s5339_s21 = sadd.s32 1, %s5070_s16  }
  0xab   : > { %s46_s7 = sadd.s32 1, %s5066_s15  ;;  %s43_s2 = ssub.s32 %s5070_s16, %s5339_s21 }
  0xac   : > { %p53_p8 = scmp.ne.s32.totalorder %s5066_s15, %s5062_s30  ;;  %p44_p1 = scmp.eq.s32.totalorder %s43_s2, 0 }
  0xad   : > { %p54_p3 = scmp.eq.s32.totalorder %s5070_s16, 0  ;;  %p59_p11 = scmp.ne.s32.totalorder %s5062_s30, %s5058_s29 }
  0xae   : > { %p319_p12 = scmp.eq.s32.totalorder %s5191_s19, 1  ;;  %p5801_p0 = scmp.eq.s32.totalorder %s5191_s19, 0 }
  0xaf   : > { %s5351_s4 = scalar_select %p44_p1, %s5066_s15, %s46_s7  }
  0xb0   : > { %p55_p13 = por %p54_p3, %p53_p8  ;;  %p5355_p2 = por %p5801_p0, %p59_p11 }
  0xb1   : > { %p5359_p6 = por %p319_p12, %p53_p8  ;;  %p325_p5 = scmp.eq.s32.totalorder %s5778_s23, 1 }
  0xb2   : > { %p4287_p7 = scmp.lt.s32.totalorder %s5070_s16, 2  ;;  %s5367_s13 = sand.u32 1, %s5066_s15  }
  0xb3   : > { %s5803_s22 = scalar_select %p5359_p6, 1, 0 }
  0xb4   : > { %p5369_p9 = por %p325_p5, %p59_p11  ;;  %s3679_s26 = sshll.u32 %s5367_s13, 5 }
  0xb5   : > { %s3993_s27 = sshll.u32 %s5070_s16, 9  ;;  %s5805_s0 = sld [smem:[#allocation25_spill]] }
  0xb6   : > { %s5804_s14 = scalar_select %p5369_p9, 1, 0 }
  0xb7   : > { %s481_s12 = scalar_lea.vmem [#allocation2], %s3679_s26  ;;  %p5380_p4 = pnand %p4287_p7, %p55_p13 }
  0xb8   : > { %s488_s25 = sshll.u32 %s481_s12, 4  ;;  %s478_s11 = scalar_lea.sflag [#allocation3], %s5367_s13  ;;  %s5384_s25 = int_to_ptr.vmem [resolvable:$true] %s488_s25 }
  0xb9   : > { %p4870_p8 = pneg %p5380_p4 }
  0xbb   : > { %s5378_s18 = scalar_lea.hbm %s5805_s0, %s3993_s27  ;;  %s4873_s27 = scalar_lea.hbm %s5805_s0, 1024 }
  0xbc   : > { %s4868_s7 = scalar_lea.hbm %s5378_s18, 512  ;;  %p4874_p11 = scmp.lt.u32.totalorder %s5378_s18, %s5805_s0 }
  0xbd   : > { %p4869_p10 = scmp.ne.s32.totalorder %s5378_s18, %s4868_s7  ;;  %p4875_p12 = scmp.lt.u32.totalorder %s4873_s27, %s4868_s7 }
  0xbe   : > { %p4877_p0 = scmp.lt.u32.totalorder %s4868_s7, %s5378_s18 }
  0xbf   : > { %p4871_p1 = pnand %p4870_p8, %p4869_p10  ;;  %p4876_p13 = por %p4875_p12, %p4874_p11 }
  0xc1   : > { %p4872_p3 = pneg %p4871_p1  ;;  %p4878_p5 = por %p4877_p0, %p4876_p13 }
  0xc3   : > { %p4879_p7 = pnand %p4878_p5, %p4872_p3 }
  0xc5   : > { %4882 = shalt.err (!%p4879_p7)
}
  0xc6   : > { %s4883_s12 = scalar_lea.vmem %s5384_s25, 512  ;;  %s5083_s2 = smov [#allocation2]  }
  0xc7   : > { %p4884_p10 = scmp.ne.s32.totalorder %s5384_s25, %s4883_s12  ;;  %s4888_s26 = sshll.u32 %s5083_s2, 4  ;;  %s4889_s26 = int_to_ptr.vmem [resolvable:$false] %s4888_s26 }
  0xc8   : > { %s4890_s28 = scalar_lea.vmem %s4889_s26, 1024  ;;  %p4891_p6 = scmp.lt.s32.totalorder %s5384_s25, %s4889_s26 }
  0xc9   : > { %p4886_p1 = pnand %p4884_p10, %p4870_p8  ;;  %p4892_p11 = scmp.lt.s32.totalorder %s4890_s28, %s4883_s12 }
  0xcb   : > { %p4887_p9 = pneg %p4886_p1  ;;  %p4893_p12 = por %p4892_p11, %p4891_p6 }
  0xcd   : > { %p4894_p13 = pnand %p4893_p12, %p4887_p9 }
  0xcf   : > { %4897 = shalt.err (!%p4894_p13)
}
  0xd0   : > { %s5084_s7 = smov 128   ;;  %s5085_s27 = smov 8  }
  0xd1   : > { %4268 = dma.hbm_to_vmem [thread:$0]  (!%p5380_p4), %s5378_s18, 512, %s5384_s25, %s478_s11, %s5084_s7, %s5084_s7, %s5085_s27  }
  0xd2   : > { %s498_s24 = sand.u32 1, %s5070_s16   ;;  %s4214_s2 = smul.u32 48, %s5367_s13 }
  0xd3   : > { %s4215_s26 = smul.u32 768, %s5070_s16  ;;  %s5424_s8 = scalar_lea.sflag [#allocation6], %s498_s24 }
  0xd4   : > { %s502_s0 = scalar_lea.vmem [#allocation5], %s4214_s2  ;;  %s4903_s25 = scalar_lea.hbm %s5754_s1, 1536 }
  0xd5   : > { %s5420_s23 = scalar_lea.hbm %s5754_s1, %s4215_s26  ;;  %s510_s6 = sshll.u32 %s502_s0, 4  ;;  %s5422_s6 = int_to_ptr.vmem [resolvable:$true] %s510_s6 }
  0xd6   : > { %s4898_s10 = scalar_lea.hbm %s5420_s23, 768  ;;  %p4904_p0 = scmp.lt.u32.totalorder %s5420_s23, %s5754_s1 }
  0xd7   : > { %p4899_p6 = scmp.ne.s32.totalorder %s5420_s23, %s4898_s10  ;;  %p4905_p5 = scmp.lt.u32.totalorder %s4903_s25, %s4898_s10 }
  0xd8   : > { %p4907_p10 = scmp.lt.u32.totalorder %s4898_s10, %s5420_s23 }
  0xd9   : > { %p4901_p9 = pnand %p4899_p6, %p4870_p8  ;;  %p4906_p7 = por %p4905_p5, %p4904_p0 }
  0xdb   : > { %p4902_p3 = pneg %p4901_p9  ;;  %p4908_p1 = por %p4907_p10, %p4906_p7 }
  0xdd   : > { %p4909_p11 = pnand %p4908_p1, %p4902_p3 }
  0xdf   : > { %4912 = shalt.err (!%p4909_p11)
}
  0xe0   : > { %s4913_s0 = scalar_lea.vmem %s5422_s6, 768  ;;  %s5086_s27 = smov [#allocation5]  }
  0xe1   : > { %p4914_p12 = scmp.ne.s32.totalorder %s5422_s6, %s4913_s0  ;;  %s4918_s24 = sshll.u32 %s5086_s27, 4  ;;  %s4919_s24 = int_to_ptr.vmem [resolvable:$false] %s4918_s24 }
  0xe2   : > { %s4920_s2 = scalar_lea.vmem %s4919_s24, 1536  ;;  %p4921_p9 = scmp.lt.s32.totalorder %s5422_s6, %s4919_s24 }
  0xe3   : > { %p4916_p13 = pnand %p4914_p12, %p4870_p8  ;;  %p4922_p0 = scmp.lt.s32.totalorder %s4920_s2, %s4913_s0 }
  0xe5   : > { %p4917_p6 = pneg %p4916_p13  ;;  %p4923_p5 = por %p4922_p0, %p4921_p9 }
  0xe7   : > { %p4924_p7 = pnand %p4923_p5, %p4917_p6 }
  0xe9   : > { %4927 = shalt.err (!%p4924_p7)
}
  0xea   : > { %s5807_s10 = smov 12   ;;  %s5808_s26 = smov 192  }
  0xeb   : > { %4271 = dma.hbm_to_vmem [thread:$0]  (!%p5380_p4), %s5420_s23, 768, %s5422_s6, %s5424_s8, %s5808_s26, %s5808_s26, %s5807_s10  }
  0xec   : > { %p5809_p8 = scmp.ne.s32.totalorder %s5791_s20, 0 }
  0xed   : > { %s5456_s12 = sand.u32 (!%p5809_p8), 1, %s5062_s30  }
  0xee   : > { %522 = sbr.rel (%p5809_p8) target bundleno = 1356 (0x54c), region = 68  ;;  %s5459_s28 = sshll.u32 (!%p5809_p8), %s5456_s12, 5 }
  0xef   : > { %s525_s17 = scalar_lea.sflag (!%p5809_p8), [#allocation3], %s5456_s12  ;;  %s5463_s13 = scalar_lea.vmem (!%p5809_p8), [#allocation2], %s5459_s28 }
  0xf5   : > { %5029 = dma.done.wait (%p5355_p2), %s525_s17, 512  }
  0xf6   : > { %5031 = vsyncadd (%p5355_p2), %s525_s17, 4294966784  ;;  %s533_s6 = sand.u32 1, %s5191_s19   ;;  %s4216_s8 = smul.u32 48, %s5456_s12 }
  0xf7   : > { %s534_s20 = scalar_lea.sflag [#allocation6], %s533_s6 }
  0xf8   : > { %s5473_s23 = scalar_lea.vmem [#allocation5], %s4216_s8 }
  0xf9   : > { %5033 = dma.done.wait (%p5355_p2), %s534_s20, 768  }
  0xfa   : > { %5035 = vsyncadd (%p5355_p2), %s534_s20, 4294966528  ;;  %p5810_p4 = scmp.eq.s32.totalorder %s5191_s19, 0 }
  0xfc   : > { %5037 = dma.done.wait (%p5810_p4), [#allocation6], 4096   ;;  %p5811_p3 = pmov %p5810_p4 }
  0xfe   : > { %5039 = vsyncadd (%p5811_p3), [#allocation6], 4294963200  ;;  %p5812_p10 = pmov %p5811_p3 }
  0xff   : > { %p5813_p1 = pmov %p5811_p3 }
 0x100   : > { %5041 = dma.done.wait (%p5812_p10), [#allocation9], 24576  }
 0x101   : > { %5043 = vsyncadd (%p5813_p1), [#allocation9], 4294942720  ;;  %p5814_p11 = pmov %p5813_p1 }
 0x102   : > { %p5815_p12 = pmov %p5813_p1 }
 0x103   : > { %5045 = dma.done.wait (%p5814_p11), [#allocation12], 7168  }
 0x104   : > { %5047 = vsyncadd (%p5815_p12), [#allocation12], 4294960128  ;;  %v5087_v0 = vmov 0   ;;  %v4344_v1 = vld [vmem:[#allocation7 + $0x4] ss:$16 sps:$4 sm:$0xff]   ;;  %v624_v28 = vld [vmem:[%s5463_s13 + $0x8] sm:$0xff] }
 0x105   : > { %875 = vmatprep.mubr.bf16.mxu0 %v5087_v0  ;;  %928 = vmatprep.mubr.bf16.mxu1 %v5087_v0  ;;  %v4346_v2 = vld [vmem:[#allocation7] ss:$16 sps:$4 sm:$0xff]   ;;  %v4347_v3 = vld [vmem:[#allocation7 + $0x24] ss:$16 sps:$4 sm:$0xff]   ;;  %v4368_v9 = vld [vmem:[#allocation7 + $0xc] ss:$16 sps:$4 sm:$0xff]  }
 0x106   : > { %843 = vmatprep.subr.bf16.mxu0 %v4344_v1  ;;  %v4349_v4 = vld [vmem:[#allocation7 + $0x20] ss:$16 sps:$4 sm:$0xff]   ;;  %v4350_v5 = vld [vmem:[#allocation7 + $0x44] ss:$16 sps:$4 sm:$0xff]   ;;  %v4370_v11 = vld [vmem:[#allocation7 + $0x8] ss:$16 sps:$4 sm:$0xff]   ;;  %896 = vmatprep.subr.bf16.mxu1 %v4368_v9 }
 0x107   : > { %844 = vmatpush1.bf16.msra.mxu0 %v4346_v2  ;;  %v4352_v6 = vld [vmem:[#allocation7 + $0x40] ss:$16 sps:$4 sm:$0xff]   ;;  %v4353_v7 = vld [vmem:[#allocation7 + $0x64] ss:$16 sps:$4 sm:$0xff]   ;;  %v4371_v13 = vld [vmem:[#allocation7 + $0x2c] ss:$16 sps:$4 sm:$0xff]   ;;  %897 = vmatpush1.bf16.msra.mxu1 %v4370_v11 }
 0x108   : > { %845 = vmatprep.subr.bf16.mxu0 %v4347_v3  ;;  %v4355_v8 = vld [vmem:[#allocation7 + $0x60] ss:$16 sps:$4 sm:$0xff]   ;;  %v4356_v10 = vld [vmem:[#allocation7 + $0x84] ss:$16 sps:$4 sm:$0xff]   ;;  %v4373_v14 = vld [vmem:[#allocation7 + $0x28] ss:$16 sps:$4 sm:$0xff]   ;;  %898 = vmatprep.subr.bf16.mxu1 %v4371_v13 }
 0x109   : > { %v4358_v12 = vld [vmem:[#allocation7 + $0x80] ss:$16 sps:$4 sm:$0xff]   ;;  %v4374_v15 = vld [vmem:[#allocation7 + $0x4c] ss:$16 sps:$4 sm:$0xff]   ;;  %v4359_v16 = vld [vmem:[#allocation7 + $0xa4] ss:$16 sps:$4 sm:$0xff]  }
 0x10a   : > { %v4376_v17 = vld [vmem:[#allocation7 + $0x48] ss:$16 sps:$4 sm:$0xff]   ;;  %v4361_v18 = vld [vmem:[#allocation7 + $0xa0] ss:$16 sps:$4 sm:$0xff]   ;;  %v4377_v19 = vld [vmem:[#allocation7 + $0x6c] ss:$16 sps:$4 sm:$0xff]  }
 0x10b   : > { %846 = vmatpush1.bf16.msra.mxu0 %v4349_v4  ;;  %899 = vmatpush1.bf16.msra.mxu1 %v4373_v14  ;;  %v4362_v20 = vld [vmem:[#allocation7 + $0xc4] ss:$16 sps:$4 sm:$0xff]   ;;  %v4379_v21 = vld [vmem:[#allocation7 + $0x68] ss:$16 sps:$4 sm:$0xff]   ;;  %v4364_v22 = vld [vmem:[#allocation7 + $0xc0] ss:$16 sps:$4 sm:$0xff]  }
 0x10c   : > { %847 = vmatprep.subr.bf16.mxu0 %v4350_v5  ;;  %900 = vmatprep.subr.bf16.mxu1 %v4374_v15  ;;  %v4380_v23 = vld [vmem:[#allocation7 + $0x8c] ss:$16 sps:$4 sm:$0xff]   ;;  %v4365_v24 = vld [vmem:[#allocation7 + $0xe4] ss:$16 sps:$4 sm:$0xff]   ;;  %v4367_v25 = vld [vmem:[#allocation7 + $0xe0] ss:$16 sps:$4 sm:$0xff]  }
 0x10d   : > { %v623_v26 = vld [vmem:[%s5463_s13] sm:$0xff]  ;;  %v4382_v27 = vld [vmem:[#allocation7 + $0x88] ss:$16 sps:$4 sm:$0xff]   ;;  %v4383_v29 = vld [vmem:[#allocation7 + $0xac] ss:$16 sps:$4 sm:$0xff]   ;;  %s4217_s7 = smul.u32 96, %s5456_s12 }
 0x10e   : > { %v4394_v30 = vld [vmem:[#allocation8 + $0x4] ss:$12 sps:$4 sm:$0xff]   ;;  %v627_v31 = vpack.c.bf16 %v624_v28, %v623_v26  ;;  %v4385_v32 = vld [vmem:[#allocation7 + $0xa8] ss:$16 sps:$4 sm:$0xff]   ;;  %v4386_v33 = vld [vmem:[#allocation7 + $0xcc] ss:$16 sps:$4 sm:$0xff]   ;;  %v663_v26 = vlaneseq }
 0x10f   : > { %848 = vmatpush1.bf16.msra.mxu0 %v4352_v6  ;;  %901 = vmatpush1.bf16.msra.mxu1 %v4376_v17  ;;  %v4392_v34 = vld [vmem:[#allocation8] ss:$12 sps:$4 sm:$0xff]   ;;  %v625_v35 = vld [vmem:[%s5463_s13 + $0x10] sm:$0xff]  ;;  %v4397_v36 = vld [vmem:[#allocation8 + $0x1c] ss:$12 sps:$4 sm:$0xff]   ;;  %s5540_s0 = scalar_lea.vmem [#allocation14], %s4217_s7 }
 0x110   : > { %849 = vmatprep.subr.bf16.mxu0 %v4353_v7  ;;  %902 = vmatprep.subr.bf16.mxu1 %v4377_v19  ;;  %v626_v37 = vld [vmem:[%s5463_s13 + $0x18] sm:$0xff]  ;;  %v4400_v41 = vld [vmem:[#allocation8 + $0x34] ss:$12 sps:$4 sm:$0xff]   ;;  %v4406_v50 = vld [vmem:[#allocation8 + $0x64] ss:$12 sps:$4 sm:$0xff]   ;;  %s5816_s2 = sld [smem:[#allocation29_spill]] }
 0x111   : > { %v4388_v38 = vld [vmem:[#allocation7 + $0xc8] ss:$16 sps:$4 sm:$0xff]   ;;  %v4389_v39 = vld [vmem:[#allocation7 + $0xec] ss:$16 sps:$4 sm:$0xff]   ;;  %v628_v42 = vpack.c.bf16 %v626_v37, %v625_v35  ;;  %v4412_v58 = vld [vmem:[#allocation8 + $0x94] ss:$12 sps:$4 sm:$0xff]  }
 0x112   : > { %v4395_v40 = vld [vmem:[#allocation8 + $0x18] ss:$12 sps:$4 sm:$0xff]   ;;  %v4419_v44 = vld [vmem:[#allocation8 + $0xc8] ss:$12 sps:$4 sm:$0xff]   ;;  %v4398_v45 = vld [vmem:[#allocation8 + $0x30] ss:$12 sps:$4 sm:$0xff]  }
 0x113   : > { %850 = vmatpush1.bf16.msra.mxu0 %v4355_v8  ;;  %903 = vmatpush1.bf16.msra.mxu1 %v4379_v21  ;;  %v4391_v43 = vld [vmem:[#allocation7 + $0xe8] ss:$16 sps:$4 sm:$0xff]   ;;  %v4424_v48 = vld [vmem:[#allocation8 + $0xe0] ss:$12 sps:$4 sm:$0xff]   ;;  %v4434_v57 = vld [vmem:[#allocation8 + $0x110] ss:$12 sps:$4 sm:$0xff]  }
 0x114   : > { %851 = vmatprep.subr.bf16.mxu0 %v4356_v10  ;;  %904 = vmatprep.subr.bf16.mxu1 %v4380_v23  ;;  %v4403_v46 = vld [vmem:[#allocation8 + $0x4c] ss:$12 sps:$4 sm:$0xff]   ;;  %v4420_v47 = vld [vmem:[#allocation8 + $0x8] ss:$12 sps:$4 sm:$0xff]   ;;  %v4435_v59 = vld [vmem:[#allocation8 + $0x50] ss:$12 sps:$4 sm:$0xff]  }
 0x115   : > { %v4401_v49 = vld [vmem:[#allocation8 + $0x48] ss:$12 sps:$4 sm:$0xff]   ;;  %v4425_v51 = vld [vmem:[#allocation8 + $0x20] ss:$12 sps:$4 sm:$0xff]   ;;  %v4429_v52 = vld [vmem:[#allocation8 + $0xf8] ss:$12 sps:$4 sm:$0xff]  }
 0x116   : > { %v4404_v53 = vld [vmem:[#allocation8 + $0x60] ss:$12 sps:$4 sm:$0xff]   ;;  %v4409_v54 = vld [vmem:[#allocation8 + $0x7c] ss:$12 sps:$4 sm:$0xff]   ;;  %v4407_v55 = vld [vmem:[#allocation8 + $0x78] ss:$12 sps:$4 sm:$0xff]  }
 0x117   : > { %852 = vmatpush1.bf16.msra.mxu0 %v4358_v12  ;;  %905 = vmatpush1.bf16.msra.mxu1 %v4382_v27  ;;  %v4430_v56 = vld [vmem:[#allocation8 + $0x38] ss:$12 sps:$4 sm:$0xff]   ;;  %v4439_v60 = vld [vmem:[#allocation8 + $0x128] ss:$12 sps:$4 sm:$0xff]   ;;  %v4410_v61 = vld [vmem:[#allocation8 + $0x90] ss:$12 sps:$4 sm:$0xff]  }
 0x118   : > { %853 = vmatprep.subr.bf16.mxu0 %v4359_v16  ;;  %906 = vmatprep.subr.bf16.mxu1 %v4383_v29  ;;  %v4415_v62 = vld [vmem:[#allocation8 + $0xac] ss:$12 sps:$4 sm:$0xff]   ;;  %v4440_v63 = vld [vmem:[#allocation8 + $0x68] ss:$12 sps:$4 sm:$0xff]   ;;  %v4418_v3 = vld [vmem:[#allocation8 + $0xc4] ss:$12 sps:$4 sm:$0xff]  }
 0x119   : > { %v4444_v1 = vld [vmem:[#allocation8 + $0x140] ss:$12 sps:$4 sm:$0xff]   ;;  %v4413_v2 = vld [vmem:[#allocation8 + $0xa8] ss:$12 sps:$4 sm:$0xff]   ;;  %v4421_v7 = vld [vmem:[#allocation8 + $0xd8] ss:$12 sps:$4 sm:$0xff]  }
 0x11a   : > { %v4445_v4 = vld [vmem:[#allocation8 + $0x80] ss:$12 sps:$4 sm:$0xff]   ;;  %v4423_v6 = vld [vmem:[#allocation8 + $0xdc] ss:$12 sps:$4 sm:$0xff]   ;;  %v4438_v12 = vld [vmem:[#allocation8 + $0x124] ss:$12 sps:$4 sm:$0xff]  }
 0x11b   : > { %854 = vmatpush1.bf16.msra.mxu0 %v4361_v18  ;;  %907 = vmatpush1.bf16.msra.mxu1 %v4385_v32  ;;  %v4416_v5 = vld [vmem:[#allocation8 + $0xc0] ss:$12 sps:$4 sm:$0xff]   ;;  %v4426_v9 = vld [vmem:[#allocation8 + $0xf0] ss:$12 sps:$4 sm:$0xff]   ;;  %v4431_v11 = vld [vmem:[#allocation8 + $0x108] ss:$12 sps:$4 sm:$0xff]  }
 0x11c   : > { %855 = vmatprep.subr.bf16.mxu0 %v4362_v20  ;;  %908 = vmatprep.subr.bf16.mxu1 %v4386_v33  ;;  %v4428_v8 = vld [vmem:[#allocation8 + $0xf4] ss:$12 sps:$4 sm:$0xff]   ;;  %v4433_v10 = vld [vmem:[#allocation8 + $0x10c] ss:$12 sps:$4 sm:$0xff]   ;;  %v4443_v14 = vld [vmem:[#allocation8 + $0x13c] ss:$12 sps:$4 sm:$0xff]  }
 0x11d   : > { %v4436_v13 = vld [vmem:[#allocation8 + $0x120] ss:$12 sps:$4 sm:$0xff]   ;;  %v4441_v15 = vld [vmem:[#allocation8 + $0x138] ss:$12 sps:$4 sm:$0xff]   ;;  %v4446_v18 = vld [vmem:[#allocation8 + $0x150] ss:$12 sps:$4 sm:$0xff]  }
 0x11e   : > { %v4448_v16 = vld [vmem:[#allocation8 + $0x154] ss:$12 sps:$4 sm:$0xff]   ;;  %v4449_v17 = vld [vmem:[#allocation8 + $0x158] ss:$12 sps:$4 sm:$0xff]   ;;  %v4454_v21 = vld [vmem:[#allocation8 + $0x170] ss:$12 sps:$4 sm:$0xff]  }
 0x11f   : > { %856 = vmatpush1.bf16.msra.mxu0 %v4364_v22  ;;  %909 = vmatpush1.bf16.msra.mxu1 %v4388_v38  ;;  %v4450_v19 = vld [vmem:[#allocation8 + $0x98] ss:$12 sps:$4 sm:$0xff]   ;;  %v4451_v22 = vld [vmem:[#allocation8 + $0x168] ss:$12 sps:$4 sm:$0xff]   ;;  %v4455_v23 = vld [vmem:[#allocation8 + $0xb0] ss:$12 sps:$4 sm:$0xff]  }
 0x120   : > { %857 = vmatprep.subr.bf16.mxu0 %v4365_v24  ;;  %910 = vmatprep.subr.bf16.mxu1 %v4389_v39  ;;  %v4453_v20 = vld [vmem:[#allocation8 + $0x16c] ss:$12 sps:$4 sm:$0xff]   ;;  %v4458_v24 = vld [vmem:[#allocation8 + $0x184] ss:$12 sps:$4 sm:$0xff]   ;;  %v5499_v27 = vshrl.u32 %v663_v26, 7  ;;  %s4218_s10 = smul.u32 1536, %s5191_s19 }
 0x121   : > { %v661_v29 = vld [vmem:[%s5756_s3] sm:$0xf]  ;;  %s3435_s26 = sshll.u32 %s5540_s0, 4  ;;  %s5817_s8 = sld [smem:[#allocation34_spill]]  ;;  %s5617_s26 = int_to_ptr.vmem [resolvable:$true] %s3435_s26 }
 0x122   : > { %v5502_v28 = vsub.s32 0, %v5499_v27  ;;  %s3411_s9 = scalar_lea.sflag [#allocation4], %s5456_s12  ;;  %s4928_s18 = scalar_lea.vmem %s5617_s26, 1536 }
 0x123   : > { %858 = vmatpush1.bf16.msra.mxu0 %v4367_v25  ;;  %911 = vmatpush1.bf16.msra.mxu1 %v4391_v43  ;;  %v4459_v25 = vld [vmem:[#allocation8 + $0x248] ss:$12 sps:$4 sm:$0xff]   ;;  %p4929_p2 = scmp.ne.s32.totalorder %s5617_s26, %s4928_s18  ;;  %p5818_p13 = scmp.ne.s32.totalorder %s5803_s22, 0 }
 0x124   : > { %1630 = vmatprep.subr.bf16.mxu0 %v4394_v30  ;;  %3996 = vmatprep.subr.bf16.mxu1 %v4419_v44  ;;  %v5508_v30 = vsub.s32 1, %v5499_v27  ;;  %v677_v44 = vsub.s32 3, %v5499_v27 }
 0x125   : > { %p4930_p6 = pnand %p4929_p2, %p5818_p13 }
 0x126   : > { %876 = vmatmul.mubr.bf16.vlgmr.msra.gmra.mrb[0].mxu0 %v627_v31  ;;  %929 = vmatmul.mubr.bf16.vlgmr.msra.gmra.mrb[0].mxu1 %v627_v31  ;;  %v666_v31 = vrot.slane %v661_v29, %v5502_v28  ;;  %v670_v32 = vrot.slane %v661_v29, %v5508_v30 }
 0x127   : > { %885 = vmatprep.mubr.bf16.mxu0 %v5087_v0  ;;  %1631 = vmatpush1.bf16.msra.mxu0 %v4392_v34  ;;  %s5622_s20 = scalar_lea.hbm %s5817_s8, %s4218_s10  ;;  %p4931_p9 = pneg %p4930_p6 }
 0x128   : > { %1632 = vmatprep.subr.bf16.mxu0 %v4397_v36  ;;  %938 = vmatprep.mubr.bf16.mxu1 %v5087_v0 }
 0x129   : > { %3997 = vmatpush3.bf16.msra.mxu1 %v4420_v47 }
 0x12a   : > { %3998 = vmatprep.subr.bf16.mxu1 %v4424_v48 }
 0x12b   : > { %1633 = vmatpush1.bf16.msra.mxu0 %v4395_v40 }
 0x12c   : > { %1634 = vmatprep.subr.bf16.mxu0 %v4400_v41  ;;  %v5513_v41 = vsub.s32 2, %v5499_v27 }
 0x12d   : > { %3999 = vmatpush3.bf16.msra.mxu1 %v4425_v51 }
 0x12e   : > { %886 = vmatmul.mubr.bf16.gmra.mrb[4].mxu0 %v628_v42  ;;  %4000 = vmatprep.subr.bf16.mxu1 %v4429_v52  ;;  %v5517_v52 = vrot.slane %v661_v29, %v5513_v41 }
 0x12f   : > { %1635 = vmatpush1.bf16.msra.mxu0 %v4398_v45  ;;  %939 = vmatmul.mubr.bf16.gmra.mrb[4].mxu1 %v628_v42 }
 0x130   : > { %1636 = vmatprep.subr.bf16.mxu0 %v4403_v46 }
 0x131   : > { %4001 = vmatpush3.bf16.msra.mxu1 %v4430_v56 }
 0x132   : > { %4002 = vmatprep.subr.bf16.mxu1 %v4434_v57  ;;  %v5521_v57 = vrot.slane %v661_v29, %v677_v44 }
 0x133   : > { %1637 = vmatpush1.bf16.msra.mxu0 %v4401_v49  ;;  %v4456_v49 = vld [vmem:[#allocation8 + $0x180] ss:$12 sps:$4 sm:$0xff]  }
 0x134   : > { %1638 = vmatprep.subr.bf16.mxu0 %v4406_v50  ;;  %v4460_v50 = vld [vmem:[#allocation8 + $0x188] ss:$12 sps:$4 sm:$0xff]  }
 0x135   : > { %4003 = vmatpush3.bf16.msra.mxu1 %v4435_v59 }
 0x136   : > { %4004 = vmatprep.subr.bf16.mxu1 %v4439_v60 }
 0x137   : > { %1639 = vmatpush1.bf16.msra.mxu0 %v4404_v53  ;;  %v4463_v53 = vld [vmem:[#allocation8 + $0x19c] ss:$12 sps:$4 sm:$0xff]  }
 0x138   : > { %1640 = vmatprep.subr.bf16.mxu0 %v4409_v54  ;;  %v4464_v54 = vld [vmem:[#allocation8 + $0x260] ss:$12 sps:$4 sm:$0xff]  }
 0x139   : > { %4005 = vmatpush3.bf16.msra.mxu1 %v4440_v63 }
 0x13a   : > { %4006 = vmatprep.subr.bf16.mxu1 %v4444_v1  ;;  %v4461_v1 = vld [vmem:[#allocation8 + $0x198] ss:$12 sps:$4 sm:$0xff]  }
 0x13b   : > { %1641 = vmatpush1.bf16.msra.mxu0 %v4407_v55 }
 0x13c   : > { %1642 = vmatprep.subr.bf16.mxu0 %v4412_v58 }
 0x13d   : > { %4007 = vmatpush3.bf16.msra.mxu1 %v4445_v4 }
 0x13e   : > { %4008 = vmatprep.subr.bf16.mxu1 %v4449_v17 }
 0x13f   : > { %1643 = vmatpush1.bf16.msra.mxu0 %v4410_v61 }
 0x140   : > { %1644 = vmatprep.subr.bf16.mxu0 %v4415_v62 }
 0x141   : > { %4009 = vmatpush3.bf16.msra.mxu1 %v4450_v19  ;;  %v4466_v19 = vld [vmem:[#allocation8 + $0x1b0] ss:$12 sps:$4 sm:$0xff]  }
 0x142   : > { %4010 = vmatprep.subr.bf16.mxu1 %v4454_v21 }
 0x143   : > { %1645 = vmatpush1.bf16.msra.mxu0 %v4413_v2  ;;  %v4465_v2 = vld [vmem:[#allocation8 + $0x1a0] ss:$12 sps:$4 sm:$0xff]  }
 0x144   : > { %1646 = vmatprep.subr.bf16.mxu0 %v4418_v3 }
 0x145   : > { %4011 = vmatpush3.bf16.msra.mxu1 %v4455_v23  ;;  %v4473_v23 = vld [vmem:[#allocation8 + $0x1cc] ss:$12 sps:$4 sm:$0xff]  }
 0x146   : > { %4024 = vmatprep.subr.bf16.mxu1 %v4459_v25 }
 0x147   : > { %1647 = vmatpush1.bf16.msra.mxu0 %v4416_v5 }
 0x148   : > { %1648 = vmatprep.subr.bf16.mxu0 %v4423_v6 }
 0x14b   : > { %1649 = vmatpush1.bf16.msra.mxu0 %v4421_v7  ;;  %v4468_v7 = vld [vmem:[#allocation8 + $0x1b4] ss:$12 sps:$4 sm:$0xff]  }
 0x14c   : > { %1650 = vmatprep.subr.bf16.mxu0 %v4428_v8  ;;  %v4469_v8 = vld [vmem:[#allocation8 + $0x278] ss:$12 sps:$4 sm:$0xff]  }
 0x14f   : > { %1651 = vmatpush1.bf16.msra.mxu0 %v4426_v9 }
 0x150   : > { %1652 = vmatprep.subr.bf16.mxu0 %v4433_v10 }
 0x153   : > { %1653 = vmatpush1.bf16.msra.mxu0 %v4431_v11 }
 0x154   : > { %1654 = vmatprep.subr.bf16.mxu0 %v4438_v12 }
 0x157   : > { %1655 = vmatpush1.bf16.msra.mxu0 %v4436_v13 }
 0x158   : > { %1656 = vmatprep.subr.bf16.mxu0 %v4443_v14 }
 0x15b   : > { %1657 = vmatpush1.bf16.msra.mxu0 %v4441_v15 }
 0x15c   : > { %1658 = vmatprep.subr.bf16.mxu0 %v4448_v16 }
 0x15f   : > { %1659 = vmatpush1.bf16.msra.mxu0 %v4446_v18 }
 0x160   : > { %1660 = vmatprep.subr.bf16.mxu0 %v4453_v20  ;;  %v4470_v20 = vld [vmem:[#allocation8 + $0x1b8] ss:$12 sps:$4 sm:$0xff]  }
 0x163   : > { %1661 = vmatpush1.bf16.msra.mxu0 %v4451_v22 }
 0x164   : > { %1683 = vmatprep.subr.bf16.mxu0 %v4458_v24  ;;  %v4474_v24 = vld [vmem:[#allocation8 + $0x290] ss:$12 sps:$4 sm:$0xff]  }
 0x1f9   : > { %v877_v33 = vpop.f32.mrb[0].mxu0  ;;  %v930_v63 = vpop.f32.mrb[0].mxu1 }
 0x1fa   : > { %v878_v34 = vadd.f32 %v877_v33, %v666_v31  ;;  %v879_v35 = vpop.f32.mrb[1].mxu0  ;;  %v931_v5 = vadd.f32 %v930_v63, %v5517_v52  ;;  %v932_v6 = vpop.f32.mrb[1].mxu1  ;;  %v4475_v33 = vld [vmem:[#allocation8 + $0x1d0] ss:$12 sps:$4 sm:$0xff]   ;;  %v4491_v63 = vld [vmem:[#allocation8 + $0x228] ss:$12 sps:$4 sm:$0xff]  }
 0x1fb   : > { %v880_v36 = vadd.f32 %v879_v35, %v670_v32  ;;  %v881_v37 = vpop.f32.mrb[2].mxu0  ;;  %v933_v10 = vadd.f32 %v932_v6, %v5521_v57  ;;  %v934_v11 = vpop.f32.mrb[2].mxu1  ;;  %v4504_v6 = vld [vmem:[#allocation8 + $0x274] ss:$12 sps:$4 sm:$0xff]  }
 0x1fc   : > { %v882_v38 = vadd.f32 %v881_v37, %v666_v31  ;;  %v883_v39 = vpop.f32.mrb[3].mxu0  ;;  %v949_v42 = vmax.f32 %v878_v34, 0.0  ;;  %v951_v13 = vmax.f32 %v931_v5, 0.0  ;;  %v935_v14 = vadd.f32 %v934_v11, %v5517_v52  ;;  %v936_v15 = vpop.f32.mrb[3].mxu1  ;;  %v4479_v37 = vld [vmem:[#allocation8 + $0x2a8] ss:$12 sps:$4 sm:$0xff]  }
 0x1fd   : > { %v884_v40 = vadd.f32 %v883_v39, %v670_v32  ;;  %v950_v45 = vmax.f32 %v880_v36, 0.0  ;;  %v952_v17 = vmax.f32 %v933_v10, 0.0  ;;  %v937_v18 = vadd.f32 %v936_v15, %v5521_v57  ;;  %v4478_v36 = vld [vmem:[#allocation8 + $0x1e4] ss:$12 sps:$4 sm:$0xff]   ;;  %v4508_v11 = vld [vmem:[#allocation8 + $0x2a0] ss:$12 sps:$4 sm:$0xff]  }
 0x1fe   : > { %v953_v43 = vmax.f32 %v882_v38, 0.0  ;;  %v955_v22 = vmax.f32 %v935_v14, 0.0  ;;  %v4499_v5 = vld [vmem:[#allocation8 + $0x258] ss:$12 sps:$4 sm:$0xff]   ;;  %v4516_v14 = vld [vmem:[#allocation8 + $0x2d4] ss:$12 sps:$4 sm:$0xff]  }
 0x1ff   : > { %v954_v46 = vmax.f32 %v884_v40, 0.0  ;;  %v956_v25 = vmax.f32 %v937_v18, 0.0  ;;  %v4510_v10 = vld [vmem:[#allocation8 + $0x2a4] ss:$12 sps:$4 sm:$0xff]  }
 0x200   : > { %v965_v47 = vpack.c.bf16 %v953_v43, %v949_v42  ;;  %v5527_v26 = vpack.c.bf16 %v955_v22, %v951_v13  ;;  %v4511_v13 = vld [vmem:[#allocation8 + $0x2b8] ss:$12 sps:$4 sm:$0xff]   ;;  %v4514_v15 = vld [vmem:[#allocation8 + $0x2d0] ss:$12 sps:$4 sm:$0xff]  }
 0x201   : > { %v966_v48 = vpack.c.bf16 %v954_v46, %v950_v45  ;;  %v887_v51 = vpop.f32.mrb[4].mxu0  ;;  %v968_v29 = vpack.c.bf16 %v956_v25, %v952_v17  ;;  %v4517_v17 = vld [vmem:[#allocation8 + $0x2e8] ss:$12 sps:$4 sm:$0xff]   ;;  %v4520_v18 = vld [vmem:[#allocation10] ss:$16 sps:$4 sm:$0xff]  }
 0x202   : > { %v888_v55 = vadd.f32 %v887_v51, %v666_v31  ;;  %v889_v56 = vpop.f32.mrb[5].mxu0  ;;  %v4484_v51 = vld [vmem:[#allocation8 + $0x2c0] ss:$12 sps:$4 sm:$0xff]   ;;  %v4528_v22 = vld [vmem:[#allocation10 + $0x24] ss:$16 sps:$4 sm:$0xff]  }
 0x203   : > { %1662 = vmatprep.mubr.bf16.mxu0 %v966_v48  ;;  %1768 = vmatprep.mubr.bf16.mxu1 %v966_v48  ;;  %v890_v58 = vadd.f32 %v889_v56, %v670_v32  ;;  %v891_v59 = vpop.f32.mrb[6].mxu0  ;;  %v4480_v48 = vld [vmem:[#allocation8 + $0x1e8] ss:$12 sps:$4 sm:$0xff]   ;;  %v4485_v56 = vld [vmem:[#allocation8 + $0x200] ss:$12 sps:$4 sm:$0xff]  }
 0x204   : > { %1663 = vmatmul.mubr.bf16.vlgmr.msra.gmra.mrb[8].mxu0 %v965_v47  ;;  %1769 = vmatmul.mubr.bf16.vlgmr.msra.gmra.mrb[8].mxu1 %v965_v47  ;;  %v957_v60 = vmax.f32 %v888_v55, 0.0  ;;  %v892_v61 = vadd.f32 %v891_v59, %v666_v31  ;;  %v893_v62 = vpop.f32.mrb[7].mxu0  ;;  %v940_v31 = vpop.f32.mrb[4].mxu1  ;;  %v4476_v47 = vld [vmem:[#allocation8 + $0x1e0] ss:$12 sps:$4 sm:$0xff]  }
 0x205   : > { %1684 = vmatpush1.bf16.msra.mxu0 %v4456_v49  ;;  %4025 = vmatpush3.bf16.msra.mxu1 %v4460_v50  ;;  %v958_v3 = vmax.f32 %v890_v58, 0.0  ;;  %v894_v4 = vadd.f32 %v893_v62, %v670_v32  ;;  %v4471_v32 = vld [vmem:[#allocation8 + $0x1c8] ss:$12 sps:$4 sm:$0xff]   ;;  %v941_v34 = vadd.f32 %v940_v31, %v5517_v52  ;;  %v942_v35 = vpop.f32.mrb[5].mxu1  ;;  %v4486_v59 = vld [vmem:[#allocation8 + $0x210] ss:$12 sps:$4 sm:$0xff]  }
 0x206   : > { %1685 = vmatprep.subr.bf16.mxu0 %v4463_v53  ;;  %4026 = vmatprep.subr.bf16.mxu1 %v4464_v54  ;;  %v961_v9 = vmax.f32 %v892_v61, 0.0  ;;  %v943_v38 = vadd.f32 %v942_v35, %v5521_v57  ;;  %v944_v39 = vpop.f32.mrb[6].mxu1  ;;  %v4483_v50 = vld [vmem:[#allocation8 + $0x1fc] ss:$12 sps:$4 sm:$0xff]   ;;  %v4488_v58 = vld [vmem:[#allocation8 + $0x214] ss:$12 sps:$4 sm:$0xff]  }
 0x207   : > { %v962_v12 = vmax.f32 %v894_v4, 0.0  ;;  %v959_v40 = vmax.f32 %v941_v34, 0.0  ;;  %v945_v42 = vadd.f32 %v944_v39, %v5517_v52  ;;  %v946_v43 = vpop.f32.mrb[7].mxu1  ;;  %v4481_v52 = vld [vmem:[#allocation8 + $0x1f8] ss:$12 sps:$4 sm:$0xff]  }
 0x208   : > { %v969_v16 = vpack.c.bf16 %v961_v9, %v957_v60  ;;  %v960_v45 = vmax.f32 %v943_v38, 0.0  ;;  %v947_v46 = vadd.f32 %v946_v43, %v5521_v57  ;;  %v4489_v57 = vld [vmem:[#allocation8 + $0x2d8] ss:$12 sps:$4 sm:$0xff]   ;;  %v4494_v62 = vld [vmem:[#allocation8 + $0x2f0] ss:$12 sps:$4 sm:$0xff]  }
 0x209   : > { %1686 = vmatpush1.bf16.msra.mxu0 %v4461_v1  ;;  %4027 = vmatpush3.bf16.msra.mxu1 %v4465_v2  ;;  %v970_v21 = vpack.c.bf16 %v962_v12, %v958_v3  ;;  %v963_v49 = vmax.f32 %v945_v42, 0.0  ;;  %v4490_v60 = vld [vmem:[#allocation8 + $0x218] ss:$12 sps:$4 sm:$0xff]   ;;  %v4495_v1 = vld [vmem:[#allocation8 + $0x230] ss:$12 sps:$4 sm:$0xff]  }
 0x20a   : > { %1687 = vmatprep.subr.bf16.mxu0 %v4468_v7  ;;  %4028 = vmatprep.subr.bf16.mxu1 %v4469_v8  ;;  %v964_v53 = vmax.f32 %v947_v46, 0.0  ;;  %v4493_v61 = vld [vmem:[#allocation8 + $0x22c] ss:$12 sps:$4 sm:$0xff]   ;;  %v4498_v2 = vld [vmem:[#allocation8 + $0x244] ss:$12 sps:$4 sm:$0xff]  }
 0x20b   : > { %1776 = vmatprep.mubr.bf16.mxu1 %v970_v21  ;;  %1672 = vmatprep.mubr.bf16.mxu0 %v970_v21  ;;  %v971_v54 = vpack.c.bf16 %v963_v49, %v959_v40  ;;  %v4496_v3 = vld [vmem:[#allocation8 + $0x240] ss:$12 sps:$4 sm:$0xff]   ;;  %v4501_v4 = vld [vmem:[#allocation8 + $0x25c] ss:$12 sps:$4 sm:$0xff]   ;;  %v4552_v42 = vld [vmem:[#allocation10 + $0xa4] ss:$16 sps:$4 sm:$0xff]  }
 0x20c   : > { %1777 = vmatmul.mubr.bf16.gmra.mrb[12].mxu1 %v969_v16  ;;  %1673 = vmatmul.mubr.bf16.gmra.mrb[12].mxu0 %v969_v16  ;;  %v972_v55 = vpack.c.bf16 %v964_v53, %v960_v45  ;;  %v4502_v7 = vld [vmem:[#allocation8 + $0x270] ss:$12 sps:$4 sm:$0xff]   ;;  %v4507_v8 = vld [vmem:[#allocation8 + $0x28c] ss:$12 sps:$4 sm:$0xff]   ;;  %v4505_v9 = vld [vmem:[#allocation8 + $0x288] ss:$12 sps:$4 sm:$0xff]  }
 0x20d   : > { %1688 = vmatpush1.bf16.msra.mxu0 %v4466_v19  ;;  %4029 = vmatpush3.bf16.msra.mxu1 %v4470_v20  ;;  %v4513_v12 = vld [vmem:[#allocation8 + $0x2bc] ss:$12 sps:$4 sm:$0xff]   ;;  %v4519_v16 = vld [vmem:[#allocation8 + $0x2ec] ss:$12 sps:$4 sm:$0xff]   ;;  %v4522_v19 = vld [vmem:[#allocation10 + $0x4] ss:$16 sps:$4 sm:$0xff]  }
 0x20e   : > { %1689 = vmatprep.subr.bf16.mxu0 %v4473_v23  ;;  %4030 = vmatprep.subr.bf16.mxu1 %v4474_v24  ;;  %v4523_v20 = vld [vmem:[#allocation10 + $0x8] ss:$16 sps:$4 sm:$0xff]   ;;  %v4525_v21 = vld [vmem:[#allocation10 + $0xc] ss:$16 sps:$4 sm:$0xff]   ;;  %v4526_v24 = vld [vmem:[#allocation10 + $0x20] ss:$16 sps:$4 sm:$0xff]  }
 0x20f   : > { %1817 = vmatprep.mubr.bf16.mxu1 %v968_v29  ;;  %1715 = vmatprep.mubr.bf16.mxu0 %v968_v29  ;;  %v4531_v23 = vld [vmem:[#allocation10 + $0x2c] ss:$16 sps:$4 sm:$0xff]   ;;  %v4529_v25 = vld [vmem:[#allocation10 + $0x28] ss:$16 sps:$4 sm:$0xff]   ;;  %v4534_v29 = vld [vmem:[#allocation10 + $0x44] ss:$16 sps:$4 sm:$0xff]  }
 0x210   : > { %v4537_v31 = vld [vmem:[#allocation10 + $0x4c] ss:$16 sps:$4 sm:$0xff]   ;;  %v4538_v35 = vld [vmem:[#allocation10 + $0x60] ss:$16 sps:$4 sm:$0xff]   ;;  %v4547_v40 = vld [vmem:[#allocation10 + $0x88] ss:$16 sps:$4 sm:$0xff]  }
 0x211   : > { %1690 = vmatpush1.bf16.msra.mxu0 %v4471_v32  ;;  %4031 = vmatpush3.bf16.msra.mxu1 %v4475_v33  ;;  %v4535_v32 = vld [vmem:[#allocation10 + $0x48] ss:$16 sps:$4 sm:$0xff]   ;;  %v4540_v33 = vld [vmem:[#allocation10 + $0x64] ss:$16 sps:$4 sm:$0xff]   ;;  %v4543_v34 = vld [vmem:[#allocation10 + $0x6c] ss:$16 sps:$4 sm:$0xff]  }
 0x212   : > { %1691 = vmatprep.subr.bf16.mxu0 %v4478_v36  ;;  %4032 = vmatprep.subr.bf16.mxu1 %v4479_v37  ;;  %v4541_v36 = vld [vmem:[#allocation10 + $0x68] ss:$16 sps:$4 sm:$0xff]   ;;  %v4546_v37 = vld [vmem:[#allocation10 + $0x84] ss:$16 sps:$4 sm:$0xff]   ;;  %v4549_v38 = vld [vmem:[#allocation10 + $0x8c] ss:$16 sps:$4 sm:$0xff]  }
 0x213   : > { %v4544_v39 = vld [vmem:[#allocation10 + $0x80] ss:$16 sps:$4 sm:$0xff]   ;;  %v4555_v43 = vld [vmem:[#allocation10 + $0xac] ss:$16 sps:$4 sm:$0xff]   ;;  %v4553_v46 = vld [vmem:[#allocation10 + $0xa8] ss:$16 sps:$4 sm:$0xff]  }
 0x214   : > { %v4550_v45 = vld [vmem:[#allocation10 + $0xa0] ss:$16 sps:$4 sm:$0xff]   ;;  %v4567_v53 = vld [vmem:[#allocation10 + $0xec] ss:$16 sps:$4 sm:$0xff]  }
 0x215   : > { %1692 = vmatpush1.bf16.msra.mxu0 %v4476_v47  ;;  %4033 = vmatpush3.bf16.msra.mxu1 %v4480_v48  ;;  %v4558_v47 = vld [vmem:[#allocation10 + $0xc4] ss:$16 sps:$4 sm:$0xff]   ;;  %v4561_v48 = vld [vmem:[#allocation10 + $0xcc] ss:$16 sps:$4 sm:$0xff]   ;;  %v4556_v49 = vld [vmem:[#allocation10 + $0xc0] ss:$16 sps:$4 sm:$0xff]  }
 0x216   : > { %1693 = vmatprep.subr.bf16.mxu0 %v4483_v50  ;;  %4034 = vmatprep.subr.bf16.mxu1 %v4484_v51  ;;  %v4559_v50 = vld [vmem:[#allocation10 + $0xc8] ss:$16 sps:$4 sm:$0xff]   ;;  %v4564_v51 = vld [vmem:[#allocation10 + $0xe4] ss:$16 sps:$4 sm:$0xff]  }
 0x219   : > { %1694 = vmatpush1.bf16.msra.mxu0 %v4481_v52  ;;  %4035 = vmatpush3.bf16.msra.mxu1 %v4485_v56  ;;  %v4570_v52 = vld [vmem:[#allocation10 + $0x104] ss:$16 sps:$4 sm:$0xff]   ;;  %v4573_v56 = vld [vmem:[#allocation10 + $0x10c] ss:$16 sps:$4 sm:$0xff]  }
 0x21a   : > { %1695 = vmatprep.subr.bf16.mxu0 %v4488_v58  ;;  %4036 = vmatprep.subr.bf16.mxu1 %v4489_v57  ;;  %v4568_v58 = vld [vmem:[#allocation10 + $0x100] ss:$16 sps:$4 sm:$0xff]   ;;  %v4571_v57 = vld [vmem:[#allocation10 + $0x108] ss:$16 sps:$4 sm:$0xff]  }
 0x21d   : > { %1696 = vmatpush1.bf16.msra.mxu0 %v4486_v59  ;;  %4037 = vmatpush3.bf16.msra.mxu1 %v4490_v60  ;;  %v4576_v59 = vld [vmem:[#allocation10 + $0x124] ss:$16 sps:$4 sm:$0xff]   ;;  %v4574_v60 = vld [vmem:[#allocation10 + $0x120] ss:$16 sps:$4 sm:$0xff]  }
 0x21e   : > { %1697 = vmatprep.subr.bf16.mxu0 %v4493_v61  ;;  %4038 = vmatprep.subr.bf16.mxu1 %v4494_v62  ;;  %v4577_v61 = vld [vmem:[#allocation10 + $0x128] ss:$16 sps:$4 sm:$0xff]   ;;  %v4579_v62 = vld [vmem:[#allocation10 + $0x12c] ss:$16 sps:$4 sm:$0xff]  }
 0x221   : > { %1698 = vmatpush1.bf16.msra.mxu0 %v4491_v63  ;;  %4039 = vmatpush3.bf16.msra.mxu1 %v4495_v1  ;;  %v4582_v63 = vld [vmem:[#allocation10 + $0x144] ss:$16 sps:$4 sm:$0xff]   ;;  %v4585_v1 = vld [vmem:[#allocation10 + $0x14c] ss:$16 sps:$4 sm:$0xff]  }
 0x222   : > { %1699 = vmatprep.subr.bf16.mxu0 %v4498_v2  ;;  %2462 = vmatprep.subr.bf16.mxu1 %v4522_v19  ;;  %v4580_v2 = vld [vmem:[#allocation10 + $0x140] ss:$16 sps:$4 sm:$0xff]   ;;  %v4607_v19 = vld [vmem:[#allocation10 + $0x1c8] ss:$16 sps:$4 sm:$0xff]  }
 0x224   : > { %1818 = vmatmul.mubr.bf16.vlgmr.msra.gmra.mrb[16].mxu1 %v5527_v26 }
 0x225   : > { %1700 = vmatpush1.bf16.msra.mxu0 %v4496_v3  ;;  %1825 = vmatprep.mubr.bf16.mxu1 %v972_v55  ;;  %v4583_v3 = vld [vmem:[#allocation10 + $0x148] ss:$16 sps:$4 sm:$0xff]  }
 0x226   : > { %1701 = vmatprep.subr.bf16.mxu0 %v4501_v4  ;;  %2463 = vmatpush1.bf16.msra.mxu1 %v4520_v18  ;;  %v4588_v4 = vld [vmem:[#allocation10 + $0x164] ss:$16 sps:$4 sm:$0xff]   ;;  %v4604_v18 = vld [vmem:[#allocation10 + $0x1c0] ss:$16 sps:$4 sm:$0xff]  }
 0x227   : > { %2464 = vmatprep.subr.bf16.mxu1 %v4528_v22  ;;  %v4610_v22 = vld [vmem:[#allocation10 + $0x1e0] ss:$16 sps:$4 sm:$0xff]  }
 0x229   : > { %1702 = vmatpush1.bf16.msra.mxu0 %v4499_v5  ;;  %v4586_v5 = vld [vmem:[#allocation10 + $0x160] ss:$16 sps:$4 sm:$0xff]  }
 0x22a   : > { %1703 = vmatprep.subr.bf16.mxu0 %v4504_v6  ;;  %2465 = vmatpush1.bf16.msra.mxu1 %v4526_v24  ;;  %v4589_v6 = vld [vmem:[#allocation10 + $0x168] ss:$16 sps:$4 sm:$0xff]   ;;  %v4618_v24 = vld [vmem:[#allocation10 + $0x204] ss:$16 sps:$4 sm:$0xff]  }
 0x22b   : > { %2466 = vmatprep.subr.bf16.mxu1 %v4534_v29 }
 0x22c   : > { %1826 = vmatmul.mubr.bf16.gmra.mrb[20].mxu1 %v971_v54 }
 0x22d   : > { %1704 = vmatpush1.bf16.msra.mxu0 %v4502_v7  ;;  %v4591_v7 = vld [vmem:[#allocation10 + $0x16c] ss:$16 sps:$4 sm:$0xff]  }
 0x22e   : > { %1705 = vmatprep.subr.bf16.mxu0 %v4507_v8  ;;  %v4594_v8 = vld [vmem:[#allocation10 + $0x184] ss:$16 sps:$4 sm:$0xff]  }
 0x231   : > { %1706 = vmatpush1.bf16.msra.mxu0 %v4505_v9  ;;  %v4597_v9 = vld [vmem:[#allocation10 + $0x18c] ss:$16 sps:$4 sm:$0xff]  }
 0x232   : > { %1707 = vmatprep.subr.bf16.mxu0 %v4510_v10  ;;  %v4592_v10 = vld [vmem:[#allocation10 + $0x180] ss:$16 sps:$4 sm:$0xff]  }
 0x235   : > { %1708 = vmatpush1.bf16.msra.mxu0 %v4508_v11  ;;  %v4595_v11 = vld [vmem:[#allocation10 + $0x188] ss:$16 sps:$4 sm:$0xff]  }
 0x236   : > { %1709 = vmatprep.subr.bf16.mxu0 %v4513_v12  ;;  %v4600_v12 = vld [vmem:[#allocation10 + $0x1a4] ss:$16 sps:$4 sm:$0xff]  }
 0x239   : > { %1710 = vmatpush1.bf16.msra.mxu0 %v4511_v13  ;;  %v4603_v13 = vld [vmem:[#allocation10 + $0x1ac] ss:$16 sps:$4 sm:$0xff]  }
 0x23a   : > { %1711 = vmatprep.subr.bf16.mxu0 %v4516_v14  ;;  %v4598_v14 = vld [vmem:[#allocation10 + $0x1a0] ss:$16 sps:$4 sm:$0xff]  }
 0x23d   : > { %1712 = vmatpush1.bf16.msra.mxu0 %v4514_v15  ;;  %v4601_v15 = vld [vmem:[#allocation10 + $0x1a8] ss:$16 sps:$4 sm:$0xff]  }
 0x23e   : > { %1713 = vmatprep.subr.bf16.mxu0 %v4519_v16  ;;  %v4606_v16 = vld [vmem:[#allocation10 + $0x1c4] ss:$16 sps:$4 sm:$0xff]  }
 0x241   : > { %1714 = vmatpush1.bf16.msra.mxu0 %v4517_v17  ;;  %v4609_v17 = vld [vmem:[#allocation10 + $0x1cc] ss:$16 sps:$4 sm:$0xff]  }
 0x242   : > { %2568 = vmatprep.subr.bf16.mxu0 %v4525_v21  ;;  %v4615_v21 = vld [vmem:[#allocation10 + $0x1ec] ss:$16 sps:$4 sm:$0xff]  }
 0x244   : > { %1716 = vmatmul.mubr.bf16.vlgmr.msra.gmra.mrb[8].mxu0 %v5527_v26  ;;  %v4532_v26 = vld [vmem:[#allocation10 + $0x40] ss:$16 sps:$4 sm:$0xff]  }
 0x245   : > { %1725 = vmatprep.mubr.bf16.mxu0 %v972_v55  ;;  %2569 = vmatpush1.bf16.msra.mxu0 %v4523_v20  ;;  %v4565_v55 = vld [vmem:[#allocation10 + $0xe8] ss:$16 sps:$4 sm:$0xff]   ;;  %v4612_v20 = vld [vmem:[#allocation10 + $0x1e4] ss:$16 sps:$4 sm:$0xff]  }
 0x246   : > { %2570 = vmatprep.subr.bf16.mxu0 %v4531_v23  ;;  %2467 = vmatpush1.bf16.msra.mxu1 %v4532_v26  ;;  %v4613_v23 = vld [vmem:[#allocation10 + $0x1e8] ss:$16 sps:$4 sm:$0xff]  }
 0x247   : > { %2468 = vmatprep.subr.bf16.mxu1 %v4540_v33 }
 0x249   : > { %2571 = vmatpush1.bf16.msra.mxu0 %v4529_v25  ;;  %v4621_v25 = vld [vmem:[#allocation10 + $0x20c] ss:$16 sps:$4 sm:$0xff]  }
 0x24a   : > { %2572 = vmatprep.subr.bf16.mxu0 %v4537_v31  ;;  %2469 = vmatpush1.bf16.msra.mxu1 %v4538_v35 }
 0x24b   : > { %2470 = vmatprep.subr.bf16.mxu1 %v4546_v37 }
 0x24c   : > { %1726 = vmatmul.mubr.bf16.gmra.mrb[12].mxu0 %v971_v54  ;;  %v4562_v54 = vld [vmem:[#allocation10 + $0xe0] ss:$16 sps:$4 sm:$0xff]  }
 0x24d   : > { %2573 = vmatpush1.bf16.msra.mxu0 %v4535_v32 }
 0x24e   : > { %2574 = vmatprep.subr.bf16.mxu0 %v4543_v34  ;;  %2471 = vmatpush1.bf16.msra.mxu1 %v4544_v39 }
 0x24f   : > { %2472 = vmatprep.subr.bf16.mxu1 %v4552_v42  ;;  %v1101_v42 = vld [vmem:[%s5758_s5] sm:$0x7] }
 0x251   : > { %2575 = vmatpush1.bf16.msra.mxu0 %v4541_v36 }
 0x252   : > { %2576 = vmatprep.subr.bf16.mxu0 %v4549_v38  ;;  %2473 = vmatpush1.bf16.msra.mxu1 %v4550_v45 }
 0x253   : > { %2474 = vmatprep.subr.bf16.mxu1 %v4558_v47 }
 0x255   : > { %2577 = vmatpush1.bf16.msra.mxu0 %v4547_v40 }
 0x256   : > { %2578 = vmatprep.subr.bf16.mxu0 %v4555_v43  ;;  %2475 = vmatpush1.bf16.msra.mxu1 %v4556_v49  ;;  %v1114_v43 = vrot.slane %v1101_v42, %v5513_v41 }
 0x257   : > { %2476 = vmatprep.subr.bf16.mxu1 %v4564_v51 }
 0x259   : > { %2579 = vmatpush1.bf16.msra.mxu0 %v4553_v46 }
 0x25a   : > { %2580 = vmatprep.subr.bf16.mxu0 %v4561_v48  ;;  %2477 = vmatpush1.bf16.msra.mxu1 %v4562_v54 }
 0x25b   : > { %2478 = vmatprep.subr.bf16.mxu1 %v4570_v52 }
 0x25d   : > { %2581 = vmatpush1.bf16.msra.mxu0 %v4559_v50 }
 0x25e   : > { %2582 = vmatprep.subr.bf16.mxu0 %v4567_v53  ;;  %2479 = vmatpush1.bf16.msra.mxu1 %v4568_v58 }
 0x25f   : > { %2480 = vmatprep.subr.bf16.mxu1 %v4576_v59 }
 0x261   : > { %2583 = vmatpush1.bf16.msra.mxu0 %v4565_v55 }
 0x262   : > { %2584 = vmatprep.subr.bf16.mxu0 %v4573_v56  ;;  %2481 = vmatpush1.bf16.msra.mxu1 %v4574_v60 }
 0x263   : > { %2482 = vmatprep.subr.bf16.mxu1 %v4582_v63 }
 0x265   : > { %2585 = vmatpush1.bf16.msra.mxu0 %v4571_v57 }
 0x266   : > { %2586 = vmatprep.subr.bf16.mxu0 %v4579_v62  ;;  %2483 = vmatpush1.bf16.msra.mxu1 %v4580_v2 }
 0x267   : > { %2484 = vmatprep.subr.bf16.mxu1 %v4588_v4 }
 0x269   : > { %2587 = vmatpush1.bf16.msra.mxu0 %v4577_v61 }
 0x26a   : > { %2588 = vmatprep.subr.bf16.mxu0 %v4585_v1  ;;  %2485 = vmatpush1.bf16.msra.mxu1 %v4586_v5 }
 0x26b   : > { %2486 = vmatprep.subr.bf16.mxu1 %v4594_v8  ;;  %v1106_v8 = vrot.slane %v1101_v42, %v5502_v28 }
 0x26d   : > { %2589 = vmatpush1.bf16.msra.mxu0 %v4583_v3 }
 0x26e   : > { %2590 = vmatprep.subr.bf16.mxu0 %v4591_v7  ;;  %2487 = vmatpush1.bf16.msra.mxu1 %v4592_v10 }
 0x26f   : > { %2488 = vmatprep.subr.bf16.mxu1 %v4600_v12 }
 0x271   : > { %2591 = vmatpush1.bf16.msra.mxu0 %v4589_v6 }
 0x272   : > { %2592 = vmatprep.subr.bf16.mxu0 %v4597_v9  ;;  %2489 = vmatpush1.bf16.msra.mxu1 %v4598_v14  ;;  %v1110_v9 = vrot.slane %v1101_v42, %v5508_v30  ;;  %v4622_v42 = vld [vmem:[#allocation10 + $0x220] ss:$16 sps:$4 sm:$0xff]  }
 0x273   : > { %2490 = vmatprep.subr.bf16.mxu1 %v4606_v16 }
 0x275   : > { %2593 = vmatpush1.bf16.msra.mxu0 %v4595_v11 }
 0x276   : > { %2594 = vmatprep.subr.bf16.mxu0 %v4603_v13  ;;  %2491 = vmatpush1.bf16.msra.mxu1 %v4604_v18 }
 0x277   : > { %2492 = vmatprep.subr.bf16.mxu1 %v4612_v20 }
 0x279   : > { %2595 = vmatpush1.bf16.msra.mxu0 %v4601_v15 }
 0x27a   : > { %2596 = vmatprep.subr.bf16.mxu0 %v4609_v17  ;;  %2493 = vmatpush1.bf16.msra.mxu1 %v4610_v22 }
 0x27b   : > { %2515 = vmatprep.subr.bf16.mxu1 %v4618_v24 }
 0x27d   : > { %2597 = vmatpush1.bf16.msra.mxu0 %v4607_v19 }
 0x27e   : > { %2598 = vmatprep.subr.bf16.mxu0 %v4615_v21 }
 0x281   : > { %2599 = vmatpush1.bf16.msra.mxu0 %v4613_v23 }
 0x282   : > { %2621 = vmatprep.subr.bf16.mxu0 %v4621_v25  ;;  %v4616_v25 = vld [vmem:[#allocation10 + $0x200] ss:$16 sps:$4 sm:$0xff]  }
 0x2d7   : > { %v4012_v29 = vpop.f32.mrb[8].mxu1 }
 0x2d8   : > { %v4013_v31 = vpop.f32.mrb[9].mxu1 }
 0x2d9   : > { %v4014_v26 = vadd.f32 %v4013_v31, %v4012_v29  ;;  %v4015_v32 = vpop.f32.mrb[10].mxu1  ;;  %v4619_v29 = vld [vmem:[#allocation10 + $0x208] ss:$16 sps:$4 sm:$0xff]  }
 0x2da   : > { %v4016_v33 = vpop.f32.mrb[11].mxu1 }
 0x2db   : > { %v4017_v34 = vadd.f32 %v4016_v33, %v4015_v32  ;;  %v1771_v47 = vadd.f32 %v4014_v26, %v1114_v43  ;;  %v4624_v32 = vld [vmem:[#allocation10 + $0x224] ss:$16 sps:$4 sm:$0xff]   ;;  %v4627_v33 = vld [vmem:[#allocation10 + $0x22c] ss:$16 sps:$4 sm:$0xff]  }
 0x2dd   : > { %v1774_v51 = vadd.f32 %v4017_v34, %v1114_v43 }
 0x2df   : > { %v4018_v35 = vpop.f32.mrb[12].mxu1 }
 0x2e0   : > { %v4019_v36 = vpop.f32.mrb[13].mxu1 }
 0x2e1   : > { %v4020_v37 = vadd.f32 %v4019_v36, %v4018_v35  ;;  %v4021_v38 = vpop.f32.mrb[14].mxu1 }
 0x2e2   : > { %v4022_v39 = vpop.f32.mrb[15].mxu1 }
 0x2e3   : > { %v4023_v40 = vadd.f32 %v4022_v39, %v4021_v38  ;;  %v1779_v56 = vadd.f32 %v4020_v37, %v1114_v43 }
 0x2e5   : > { %v1782_v60 = vadd.f32 %v4023_v40, %v1114_v43  ;;  %v4625_v43 = vld [vmem:[#allocation10 + $0x228] ss:$16 sps:$4 sm:$0xff]  }
 0x2f7   : > { %v4040_v45 = vpop.f32.mrb[16].mxu1 }
 0x2f8   : > { %v4041_v46 = vpop.f32.mrb[17].mxu1 }
 0x2f9   : > { %v4042_v48 = vadd.f32 %v4041_v46, %v4040_v45  ;;  %v4043_v49 = vpop.f32.mrb[18].mxu1  ;;  %v4630_v46 = vld [vmem:[#allocation10 + $0x244] ss:$16 sps:$4 sm:$0xff]  }
 0x2fa   : > { %v4044_v50 = vpop.f32.mrb[19].mxu1 }
 0x2fb   : > { %v1820_v53 = vadd.f32 %v4042_v48, %v1771_v47  ;;  %v4045_v54 = vadd.f32 %v4044_v50, %v4043_v49  ;;  %v4633_v47 = vld [vmem:[#allocation10 + $0x24c] ss:$16 sps:$4 sm:$0xff]  }
 0x2fd   : > { %v1836_v55 = vmax.f32 %v1820_v53, 0.0  ;;  %v1823_v52 = vadd.f32 %v4045_v54, %v1774_v51  ;;  %v4628_v51 = vld [vmem:[#allocation10 + $0x240] ss:$16 sps:$4 sm:$0xff]   ;;  %v4631_v53 = vld [vmem:[#allocation10 + $0x248] ss:$16 sps:$4 sm:$0xff]  }
 0x2fe   : > { %v4636_v54 = vld [vmem:[#allocation10 + $0x264] ss:$16 sps:$4 sm:$0xff]  }
 0x2ff   : > { %1848 = vst [vmem:[%s5540_s0 + $0x10] sm:$0xff] %v1836_v55  ;;  %v1839_v58 = vmax.f32 %v1823_v52, 0.0  ;;  %v4046_v57 = vpop.f32.mrb[20].mxu1  ;;  %v4634_v52 = vld [vmem:[#allocation10 + $0x260] ss:$16 sps:$4 sm:$0xff]  }
 0x300   : > { %v4047_v59 = vpop.f32.mrb[21].mxu1 }
 0x301   : > { %1851 = vst [vmem:[%s5540_s0 + $0x28] sm:$0xff] %v1839_v58  ;;  %v5544_v61 = vpack.c.bf16 %v1839_v58, %v1836_v55  ;;  %v4048_v62 = vadd.f32 %v4047_v59, %v4046_v57  ;;  %v4049_v63 = vpop.f32.mrb[22].mxu1  ;;  %v4639_v55 = vld [vmem:[#allocation10 + $0x26c] ss:$16 sps:$4 sm:$0xff]   ;;  %v4642_v58 = vld [vmem:[#allocation10 + $0x284] ss:$16 sps:$4 sm:$0xff]  }
 0x302   : > { %v4050_v1 = vpop.f32.mrb[23].mxu1  ;;  %v4645_v57 = vld [vmem:[#allocation10 + $0x28c] ss:$16 sps:$4 sm:$0xff]   ;;  %v4640_v59 = vld [vmem:[#allocation10 + $0x280] ss:$16 sps:$4 sm:$0xff]  }
 0x303   : > { %v1828_v2 = vadd.f32 %v4048_v62, %v1779_v56  ;;  %v4051_v3 = vadd.f32 %v4050_v1, %v4049_v63  ;;  %v4637_v56 = vld [vmem:[#allocation10 + $0x268] ss:$16 sps:$4 sm:$0xff]   ;;  %v4648_v62 = vld [vmem:[#allocation10 + $0x2a4] ss:$16 sps:$4 sm:$0xff]   ;;  %v4651_v63 = vld [vmem:[#allocation10 + $0x2ac] ss:$16 sps:$4 sm:$0xff]  }
 0x304   : > { %v4646_v1 = vld [vmem:[#allocation10 + $0x2a0] ss:$16 sps:$4 sm:$0xff]  }
 0x305   : > { %v1842_v4 = vmax.f32 %v1828_v2, 0.0  ;;  %v1831_v5 = vadd.f32 %v4051_v3, %v1782_v60  ;;  %v4643_v60 = vld [vmem:[#allocation10 + $0x288] ss:$16 sps:$4 sm:$0xff]   ;;  %v4654_v3 = vld [vmem:[#allocation10 + $0x2c4] ss:$16 sps:$4 sm:$0xff]  }
 0x306   : > { %v4649_v2 = vld [vmem:[#allocation10 + $0x2a8] ss:$16 sps:$4 sm:$0xff]  }
 0x307   : > { %1854 = vst [vmem:[%s5540_s0 + $0x40] sm:$0xff] %v1842_v4  ;;  %v1845_v6 = vmax.f32 %v1831_v5, 0.0  ;;  %v4652_v5 = vld [vmem:[#allocation10 + $0x2c0] ss:$16 sps:$4 sm:$0xff]  }
 0x309   : > { %1857 = vst [vmem:[%s5540_s0 + $0x58] sm:$0xff] %v1845_v6  ;;  %v5548_v7 = vpack.c.bf16 %v1845_v6, %v1842_v4  ;;  %v4657_v4 = vld [vmem:[#allocation10 + $0x2cc] ss:$16 sps:$4 sm:$0xff]   ;;  %v4655_v6 = vld [vmem:[#allocation10 + $0x2c8] ss:$16 sps:$4 sm:$0xff]  }
 0x317   : > { %v1717_v10 = vpop.f32.mrb[8].mxu0 }
 0x318   : > { %v4166_v11 = vadd.f32 %v1717_v10, %v1106_v8  ;;  %v1719_v12 = vpop.f32.mrb[9].mxu0  ;;  %v4658_v10 = vld [vmem:[#allocation10 + $0x2e0] ss:$16 sps:$4 sm:$0xff]  }
 0x319   : > { %v4167_v13 = vadd.f32 %v1719_v12, %v1110_v9  ;;  %v1721_v14 = vpop.f32.mrb[10].mxu0  ;;  %v4664_v12 = vld [vmem:[#allocation13 + $0x40] sm:$0xff]  }
 0x31a   : > { %v1834_v15 = vmax.f32 %v4166_v11, 0.0  ;;  %v4168_v16 = vadd.f32 %v1721_v14, %v1106_v8  ;;  %v1723_v17 = vpop.f32.mrb[11].mxu0  ;;  %v4661_v11 = vld [vmem:[#allocation10 + $0x2e8] ss:$16 sps:$4 sm:$0xff]   ;;  %v4665_v14 = vld [vmem:[#allocation13] sm:$0xff]  }
 0x31b   : > { %v1835_v18 = vmax.f32 %v4167_v13, 0.0  ;;  %v4169_v19 = vadd.f32 %v1723_v17, %v1110_v9  ;;  %v4687_v13 = vld [vmem:[#allocation11 + $0x40] sm:$0xff]   ;;  %v4689_v17 = vld [vmem:[#allocation11 + $0x48] sm:$0xff]  }
 0x31c   : > { %1846 = vst [vmem:[%s5540_s0] sm:$0xff] %v1834_v15  ;;  %v1837_v20 = vmax.f32 %v4168_v16, 0.0  ;;  %v4688_v16 = vld [vmem:[#allocation11] sm:$0xff]  }
 0x31d   : > { %1847 = vst [vmem:[%s5540_s0 + $0x8] sm:$0xff] %v1835_v18  ;;  %v1838_v21 = vmax.f32 %v4169_v19, 0.0  ;;  %v4669_v19 = vld [vmem:[#allocation13 + $0x50] sm:$0xff]  }
 0x31e   : > { %1849 = vst [vmem:[%s5540_s0 + $0x18] sm:$0xff] %v1837_v20  ;;  %v5555_v22 = vpack.c.bf16 %v1837_v20, %v1834_v15  ;;  %v4666_v15 = vld [vmem:[#allocation13 + $0x48] sm:$0xff]   ;;  %v4673_v20 = vld [vmem:[%s5473_s23 + $0x4] ss:$12 sps:$4 sm:$0xff]  }
 0x31f   : > { %1850 = vst [vmem:[%s5540_s0 + $0x20] sm:$0xff] %v1838_v21  ;;  %v5558_v23 = vpack.c.bf16 %v1838_v21, %v1835_v18  ;;  %v1727_v24 = vpop.f32.mrb[12].mxu0  ;;  %v4667_v18 = vld [vmem:[#allocation13 + $0x8] sm:$0xff]  }
 0x320   : > { %v4170_v31 = vadd.f32 %v1727_v24, %v1106_v8  ;;  %v1729_v26 = vpop.f32.mrb[13].mxu0  ;;  %v4690_v21 = vld [vmem:[#allocation11 + $0x8] sm:$0xff]   ;;  %v4670_v24 = vld [vmem:[#allocation13 + $0x10] sm:$0xff]  }
 0x321   : > { %v4171_v34 = vadd.f32 %v1729_v26, %v1110_v9  ;;  %v1731_v35 = vpop.f32.mrb[14].mxu0  ;;  %2494 = vmatprep.mubr.bf16.mxu1 %v5558_v23  ;;  %2600 = vmatprep.mubr.bf16.mxu0 %v5558_v23  ;;  %v4692_v26 = vld [vmem:[#allocation11 + $0x10] sm:$0xff]  }
 0x322   : > { %v1840_v36 = vmax.f32 %v4170_v31, 0.0  ;;  %v4172_v37 = vadd.f32 %v1731_v35, %v1106_v8  ;;  %v1733_v38 = vpop.f32.mrb[15].mxu0  ;;  %2495 = vmatmul.mubr.bf16.vlgmr.msra.gmra.mrb[24].mxu1 %v5555_v22  ;;  %2601 = vmatmul.mubr.bf16.vlgmr.msra.gmra.mrb[16].mxu0 %v5555_v22  ;;  %v4660_v8 = vld [vmem:[#allocation10 + $0x2e4] ss:$16 sps:$4 sm:$0xff]   ;;  %v3104_v31 = vmul.bf16 %v4673_v20, %v5558_v23  ;;  %v4678_v23 = vld [vmem:[#allocation13 + $0x68] sm:$0xff]  }
 0x323   : > { %v1841_v39 = vmax.f32 %v4171_v34, 0.0  ;;  %v4173_v40 = vadd.f32 %v1733_v38, %v1110_v9  ;;  %2516 = vmatpush1.bf16.msra.mxu1 %v4616_v25  ;;  %2622 = vmatpush1.bf16.msra.mxu0 %v4619_v29  ;;  %v4663_v9 = vld [vmem:[#allocation10 + $0x2ec] ss:$16 sps:$4 sm:$0xff]   ;;  %v4691_v29 = vld [vmem:[#allocation11 + $0x50] sm:$0xff]   ;;  %v4695_v35 = vld [vmem:[#allocation11 + $0x60] sm:$0xff]  }
 0x324   : > { %1852 = vst [vmem:[%s5540_s0 + $0x30] sm:$0xff] %v1840_v36  ;;  %v1843_v45 = vmax.f32 %v4172_v37, 0.0  ;;  %2517 = vmatprep.subr.bf16.mxu1 %v4624_v32  ;;  %2623 = vmatprep.subr.bf16.mxu0 %v4627_v33  ;;  %v4674_v25 = vld [vmem:[#allocation13 + $0x58] sm:$0xff]   ;;  %v4676_v33 = vld [vmem:[#allocation13 + $0x60] sm:$0xff]   ;;  %v4697_v38 = vld [vmem:[#allocation11 + $0x68] sm:$0xff]  }
 0x325   : > { %1853 = vst [vmem:[%s5540_s0 + $0x38] sm:$0xff] %v1841_v39  ;;  %v1844_v48 = vmax.f32 %v4173_v40, 0.0  ;;  %v4693_v32 = vld [vmem:[#allocation11 + $0x58] sm:$0xff]   ;;  %v4696_v37 = vld [vmem:[#allocation11 + $0x20] sm:$0xff]   ;;  %v4680_v40 = vld [vmem:[#allocation13 + $0x70] sm:$0xff]  }
 0x326   : > { %1855 = vst [vmem:[%s5540_s0 + $0x48] sm:$0xff] %v1843_v45  ;;  %v5567_v49 = vpack.c.bf16 %v1843_v45, %v1840_v36  ;;  %v4694_v34 = vld [vmem:[#allocation11 + $0x18] sm:$0xff]   ;;  %v4677_v36 = vld [vmem:[#allocation13 + $0x20] sm:$0xff]  }
 0x327   : > { %1856 = vst [vmem:[%s5540_s0 + $0x50] sm:$0xff] %v1844_v48  ;;  %v5570_v50 = vpack.c.bf16 %v1844_v48, %v1841_v39  ;;  %2518 = vmatpush1.bf16.msra.mxu1 %v4622_v42  ;;  %2624 = vmatpush1.bf16.msra.mxu0 %v4625_v43  ;;  %v4679_v39 = vld [vmem:[#allocation13 + $0x28] sm:$0xff]   ;;  %v4681_v43 = vld [vmem:[#allocation13 + $0x30] sm:$0xff]   ;;  %v4682_v45 = vld [vmem:[#allocation13 + $0x78] sm:$0xff]  }
 0x328   : > { %2519 = vmatprep.subr.bf16.mxu1 %v4630_v46  ;;  %2625 = vmatprep.subr.bf16.mxu0 %v4633_v47  ;;  %v4698_v42 = vld [vmem:[#allocation11 + $0x28] sm:$0xff]   ;;  %v4683_v46 = vld [vmem:[#allocation13 + $0x38] sm:$0xff]  }
 0x329   : > { %2504 = vmatprep.mubr.bf16.mxu1 %v5570_v50  ;;  %2610 = vmatprep.mubr.bf16.mxu0 %v5570_v50  ;;  %v4671_v47 = vld [vmem:[%s5473_s23] ss:$12 sps:$4 sm:$0xff]   ;;  %v4684_v48 = vld [vmem:[%s5473_s23 + $0x1c] ss:$12 sps:$4 sm:$0xff]  }
 0x32a   : > { %2505 = vmatmul.mubr.bf16.gmra.mrb[28].mxu1 %v5567_v49  ;;  %2611 = vmatmul.mubr.bf16.gmra.mrb[20].mxu0 %v5567_v49 }
 0x32b   : > { %2520 = vmatpush1.bf16.msra.mxu1 %v4628_v51  ;;  %2626 = vmatpush1.bf16.msra.mxu0 %v4631_v53  ;;  %v3103_v51 = vmul.bf16 %v4671_v47, %v5555_v22  ;;  %v3107_v53 = vmul.bf16 %v4684_v48, %v5570_v50  ;;  %v1960_v22 = vld [vmem:[%s5816_s2] sm:$0xf]  ;;  %v4706_v47 = vld [vmem:[#allocation11 + $0x88] sm:$0xff]  }
 0x32c   : > { %2521 = vmatprep.subr.bf16.mxu1 %v4636_v54  ;;  %2627 = vmatprep.subr.bf16.mxu0 %v4639_v55  ;;  %v4686_v54 = vld [vmem:[%s5473_s23 + $0x18] ss:$12 sps:$4 sm:$0xff]   ;;  %v1965_v50 = vrot.slane %v1960_v22, %v5502_v28 }
 0x32d   : > { %2547 = vmatprep.mubr.bf16.mxu1 %v5087_v0  ;;  %2653 = vmatprep.mubr.bf16.mxu0 %v5087_v0  ;;  %v3106_v55 = vmul.bf16 %v4686_v54, %v5567_v49  ;;  %v1969_v49 = vrot.slane %v1960_v22, %v5508_v30 }
 0x32f   : > { %2522 = vmatpush1.bf16.msra.mxu1 %v4634_v52  ;;  %2628 = vmatpush1.bf16.msra.mxu0 %v4637_v56  ;;  %v4699_v52 = vld [vmem:[#allocation11 + $0x70] sm:$0xff]  }
 0x330   : > { %2523 = vmatprep.subr.bf16.mxu1 %v4642_v58  ;;  %2629 = vmatprep.subr.bf16.mxu0 %v4645_v57  ;;  %v4700_v56 = vld [vmem:[#allocation11 + $0x30] sm:$0xff]   ;;  %v4701_v58 = vld [vmem:[#allocation11 + $0x78] sm:$0xff]  }
 0x331   : > { %v4702_v57 = vld [vmem:[#allocation11 + $0x38] sm:$0xff]  }
 0x333   : > { %2524 = vmatpush1.bf16.msra.mxu1 %v4640_v59  ;;  %2630 = vmatpush1.bf16.msra.mxu0 %v4643_v60  ;;  %v4703_v59 = vld [vmem:[#allocation11 + $0xc0] sm:$0xff]   ;;  %v1973_v60 = vrot.slane %v1960_v22, %v5513_v41 }
 0x334   : > { %2525 = vmatprep.subr.bf16.mxu1 %v4648_v62  ;;  %2631 = vmatprep.subr.bf16.mxu0 %v4651_v63  ;;  %v1977_v62 = vrot.slane %v1960_v22, %v677_v44 }
 0x337   : > { %2526 = vmatpush1.bf16.msra.mxu1 %v4646_v1  ;;  %2632 = vmatpush1.bf16.msra.mxu0 %v4649_v2 }
 0x338   : > { %2527 = vmatprep.subr.bf16.mxu1 %v4654_v3  ;;  %2633 = vmatprep.subr.bf16.mxu0 %v4657_v4 }
 0x33b   : > { %2528 = vmatpush1.bf16.msra.mxu1 %v4652_v5  ;;  %2634 = vmatpush1.bf16.msra.mxu0 %v4655_v6 }
 0x33c   : > { %2529 = vmatprep.subr.bf16.mxu1 %v4660_v8  ;;  %2635 = vmatprep.subr.bf16.mxu0 %v4663_v9 }
 0x33f   : > { %2530 = vmatpush1.bf16.msra.mxu1 %v4658_v10  ;;  %2636 = vmatpush1.bf16.msra.mxu0 %v4661_v11 }
 0x340   : > { %4108 = vmatprep.subr.bf16.mxu0 %v4664_v12  ;;  %4052 = vmatprep.subr.bf16.mxu1 %v4687_v13 }
 0x342   : > { %2548 = vmatmul.mubr.bf16.vlgmr.msra.gmra.mrb[24].mxu1 %v5544_v61  ;;  %2654 = vmatmul.mubr.bf16.vlgmr.msra.gmra.mrb[16].mxu0 %v5544_v61 }
 0x343   : > { %4109 = vmatpush3.bf16.msra.mxu0 %v4665_v14  ;;  %2557 = vmatprep.mubr.bf16.mxu1 %v5087_v0 }
 0x344   : > { %4110 = vmatprep.subr.bf16.mxu0 %v4666_v15  ;;  %2663 = vmatprep.mubr.bf16.mxu0 %v5087_v0  ;;  %v4675_v0 = vld [vmem:[#allocation13 + $0x18] sm:$0xff]  }
 0x345   : > { %4053 = vmatpush3.bf16.msra.mxu1 %v4688_v16 }
 0x346   : > { %4054 = vmatprep.subr.bf16.mxu1 %v4689_v17 }
 0x347   : > { %4111 = vmatpush3.bf16.msra.mxu0 %v4667_v18 }
 0x348   : > { %4112 = vmatprep.subr.bf16.mxu0 %v4669_v19 }
 0x349   : > { %4055 = vmatpush3.bf16.msra.mxu1 %v4690_v21 }
 0x34a   : > { %2558 = vmatmul.mubr.bf16.gmra.mrb[28].mxu1 %v5548_v7  ;;  %2664 = vmatmul.mubr.bf16.gmra.mrb[20].mxu0 %v5548_v7 }
 0x34b   : > { %4113 = vmatpush3.bf16.msra.mxu0 %v4670_v24  ;;  %3340 = vmatprep.mubr.bf16.mxu0 %v3104_v31 }
 0x34c   : > { %4114 = vmatprep.subr.bf16.mxu0 %v4674_v25  ;;  %4056 = vmatprep.subr.bf16.mxu1 %v4691_v29 }
 0x34d   : > { %4057 = vmatpush3.bf16.msra.mxu1 %v4692_v26  ;;  %v4704_v26 = vld [vmem:[#allocation11 + $0x80] sm:$0xff]  }
 0x34e   : > { %4058 = vmatprep.subr.bf16.mxu1 %v4693_v32 }
 0x34f   : > { %4115 = vmatpush3.bf16.msra.mxu0 %v4675_v0 }
 0x350   : > { %4116 = vmatprep.subr.bf16.mxu0 %v4676_v33 }
 0x351   : > { %4059 = vmatpush3.bf16.msra.mxu1 %v4694_v34 }
 0x352   : > { %4060 = vmatprep.subr.bf16.mxu1 %v4695_v35  ;;  %v4705_v35 = vld [vmem:[#allocation11 + $0xc8] sm:$0xff]  }
 0x353   : > { %4117 = vmatpush3.bf16.msra.mxu0 %v4677_v36 }
 0x354   : > { %4118 = vmatprep.subr.bf16.mxu0 %v4678_v23 }
 0x355   : > { %4061 = vmatpush3.bf16.msra.mxu1 %v4696_v37 }
 0x356   : > { %4062 = vmatprep.subr.bf16.mxu1 %v4697_v38 }
 0x357   : > { %4119 = vmatpush3.bf16.msra.mxu0 %v4679_v39 }
 0x358   : > { %4120 = vmatprep.subr.bf16.mxu0 %v4680_v40 }
 0x359   : > { %4063 = vmatpush3.bf16.msra.mxu1 %v4698_v42 }
 0x35a   : > { %4064 = vmatprep.subr.bf16.mxu1 %v4699_v52 }
 0x35b   : > { %4121 = vmatpush3.bf16.msra.mxu0 %v4681_v43 }
 0x35c   : > { %4122 = vmatprep.subr.bf16.mxu0 %v4682_v45 }
 0x35d   : > { %4065 = vmatpush3.bf16.msra.mxu1 %v4700_v56 }
 0x35e   : > { %4066 = vmatprep.subr.bf16.mxu1 %v4701_v58 }
 0x35f   : > { %4123 = vmatpush3.bf16.msra.mxu0 %v4683_v46 }
 0x361   : > { %4067 = vmatpush3.bf16.msra.mxu1 %v4702_v57 }
 0x362   : > { %3341 = vmatmul.mubr.bf16.vlgmr.msra.gmra.mrb[24].mxu0 %v3103_v51  ;;  %4080 = vmatprep.subr.bf16.mxu1 %v4703_v59 }
 0x363   : > { %3348 = vmatprep.mubr.bf16.mxu0 %v3107_v53 }
 0x36a   : > { %3349 = vmatmul.mubr.bf16.gmra.mrb[28].mxu0 %v3106_v55  ;;  %v4707_v55 = vld [vmem:[#allocation11 + $0xd0] sm:$0xff]  }
 0x415   : > { %v2549_v63 = vpop.f32.mrb[24].mxu1  ;;  %v2655_v1 = vpop.f32.mrb[16].mxu0 }
 0x416   : > { %v4174_v2 = vadd.f32 %v2549_v63, %v1965_v50  ;;  %v4182_v3 = vadd.f32 %v2655_v1, %v1973_v60  ;;  %v2551_v4 = vpop.f32.mrb[25].mxu1  ;;  %v2657_v5 = vpop.f32.mrb[17].mxu0  ;;  %v4708_v63 = vld [vmem:[#allocation11 + $0x90] sm:$0xff]   ;;  %v4711_v1 = vld [vmem:[#allocation11 + $0xe0] sm:$0xff]  }
 0x417   : > { %v4175_v6 = vadd.f32 %v2551_v4, %v1969_v49  ;;  %v4183_v8 = vadd.f32 %v2657_v5, %v1977_v62  ;;  %v2553_v9 = vpop.f32.mrb[26].mxu1  ;;  %v2659_v10 = vpop.f32.mrb[18].mxu0  ;;  %v4714_v4 = vld [vmem:[#allocation11 + $0xa8] sm:$0xff]   ;;  %v4715_v5 = vld [vmem:[#allocation11 + $0xf0] sm:$0xff]  }
 0x418   : > { %v4176_v11 = vadd.f32 %v2553_v9, %v1965_v50  ;;  %v4184_v12 = vadd.f32 %v2659_v10, %v1973_v60  ;;  %v2555_v28 = vpop.f32.mrb[27].mxu1  ;;  %v2661_v13 = vpop.f32.mrb[19].mxu0  ;;  %v2674_v30 = vmax.f32 %v4174_v2, 0.0  ;;  %v2676_v15 = vmax.f32 %v4182_v3, 0.0  ;;  %v4712_v2 = vld [vmem:[#allocation11 + $0xa0] sm:$0xff]   ;;  %v4713_v3 = vld [vmem:[#allocation11 + $0xe8] sm:$0xff]  }
 0x419   : > { %v4177_v41 = vadd.f32 %v2555_v28, %v1969_v49  ;;  %v4185_v14 = vadd.f32 %v2661_v13, %v1977_v62  ;;  %v2675_v16 = vmax.f32 %v4175_v6, 0.0  ;;  %v2677_v17 = vmax.f32 %v4183_v8, 0.0  ;;  %v4716_v8 = vld [vmem:[#allocation11 + $0xb0] sm:$0xff]   ;;  %v4717_v10 = vld [vmem:[#allocation11 + $0xf8] sm:$0xff]  }
 0x41a   : > { %v2678_v27 = vmax.f32 %v4176_v11, 0.0  ;;  %v2680_v44 = vmax.f32 %v4184_v12, 0.0 }
 0x41b   : > { %v2679_v18 = vmax.f32 %v4177_v41, 0.0  ;;  %v2681_v19 = vmax.f32 %v4185_v14, 0.0  ;;  %v4718_v41 = vld [vmem:[#allocation11 + $0xb8] sm:$0xff]   ;;  %v4719_v14 = vld [vmem:[#allocation13 + $0x80] sm:$0xff]  }
 0x41c   : > { %v2690_v20 = vpack.c.bf16 %v2678_v27, %v2674_v30  ;;  %v5600_v21 = vpack.c.bf16 %v2680_v44, %v2676_v15  ;;  %v4720_v27 = vld [vmem:[#allocation13 + $0x88] sm:$0xff]  }
 0x41d   : > { %v2691_v24 = vpack.c.bf16 %v2679_v18, %v2675_v16  ;;  %v2693_v25 = vpack.c.bf16 %v2681_v19, %v2677_v17  ;;  %v2559_v29 = vpop.f32.mrb[28].mxu1  ;;  %v2665_v31 = vpop.f32.mrb[20].mxu0  ;;  %v4721_v19 = vld [vmem:[#allocation13 + $0x90] sm:$0xff]  }
 0x41e   : > { %v4178_v32 = vadd.f32 %v2559_v29, %v1965_v50  ;;  %v4186_v0 = vadd.f32 %v2665_v31, %v1973_v60  ;;  %v2561_v33 = vpop.f32.mrb[29].mxu1  ;;  %v2667_v34 = vpop.f32.mrb[21].mxu0  ;;  %v4724_v29 = vld [vmem:[#allocation13 + $0xa0] sm:$0xff]   ;;  %v4726_v31 = vld [vmem:[#allocation13 + $0xb0] sm:$0xff]  }
 0x41f   : > { %v4179_v36 = vadd.f32 %v2561_v33, %v1969_v49  ;;  %v4187_v23 = vadd.f32 %v2667_v34, %v1977_v62  ;;  %v2563_v37 = vpop.f32.mrb[30].mxu1  ;;  %v2669_v38 = vpop.f32.mrb[22].mxu0  ;;  %2993 = vmatprep.mubr.bf16.mxu1 %v2691_v24  ;;  %v4723_v24 = vld [vmem:[#allocation13 + $0x98] sm:$0xff]  }
 0x420   : > { %v4180_v39 = vadd.f32 %v2563_v37, %v1965_v50  ;;  %v4188_v40 = vadd.f32 %v2669_v38, %v1973_v60  ;;  %v2565_v42 = vpop.f32.mrb[31].mxu1  ;;  %v2671_v43 = vpop.f32.mrb[23].mxu0  ;;  %2994 = vmatmul.mubr.bf16.vlgmr.msra.gmra.mrb[32].mxu1 %v2690_v20  ;;  %v2682_v48 = vmax.f32 %v4178_v32, 0.0  ;;  %v2684_v51 = vmax.f32 %v4186_v0, 0.0  ;;  %v4722_v20 = vld [vmem:[%s5473_s23 + $0x8] ss:$12 sps:$4 sm:$0xff]  }
 0x421   : > { %v4181_v45 = vadd.f32 %v2565_v42, %v1969_v49  ;;  %v4189_v46 = vadd.f32 %v2671_v43, %v1977_v62  ;;  %4081 = vmatpush3.bf16.msra.mxu1 %v4704_v26  ;;  %v2683_v52 = vmax.f32 %v4179_v36, 0.0  ;;  %v2685_v56 = vmax.f32 %v4187_v23, 0.0  ;;  %v4709_v49 = vld [vmem:[#allocation11 + $0xd8] sm:$0xff]  }
 0x422   : > { %v2686_v53 = vmax.f32 %v4180_v39, 0.0  ;;  %v2688_v54 = vmax.f32 %v4188_v40, 0.0  ;;  %4082 = vmatprep.subr.bf16.mxu1 %v4705_v35  ;;  %v4710_v62 = vld [vmem:[#allocation11 + $0x98] sm:$0xff]  }
 0x423   : > { %v2687_v58 = vmax.f32 %v4181_v45, 0.0  ;;  %v2689_v57 = vmax.f32 %v4189_v46, 0.0  ;;  %v4727_v26 = vld [vmem:[#allocation13 + $0xb8] sm:$0xff]  }
 0x424   : > { %v2694_v59 = vpack.c.bf16 %v2686_v53, %v2682_v48  ;;  %v2696_v22 = vpack.c.bf16 %v2688_v54, %v2684_v51 }
 0x425   : > { %v2695_v50 = vpack.c.bf16 %v2687_v58, %v2683_v52  ;;  %v2697_v60 = vpack.c.bf16 %v2689_v57, %v2685_v56  ;;  %4083 = vmatpush3.bf16.msra.mxu1 %v4706_v47 }
 0x426   : > { %4084 = vmatprep.subr.bf16.mxu1 %v4707_v55 }
 0x427   : > { %3001 = vmatprep.mubr.bf16.mxu1 %v2695_v50 }
 0x428   : > { %3002 = vmatmul.mubr.bf16.gmra.mrb[36].mxu1 %v2694_v59 }
 0x429   : > { %4085 = vmatpush3.bf16.msra.mxu1 %v4708_v63  ;;  %3042 = vmatprep.mubr.bf16.mxu1 %v2693_v25  ;;  %v3105_v25 = vmul.bf16 %v4722_v20, %v5544_v61  ;;  %v4668_v61 = vld [vmem:[%s5473_s23 + $0x20] ss:$12 sps:$4 sm:$0xff]   ;;  %s5088_s23 = smov [#allocation14]  }
 0x42a   : > { %4086 = vmatprep.subr.bf16.mxu1 %v4709_v49  ;;  %v3108_v32 = vmul.bf16 %v4668_v61, %v5548_v7  ;;  %s4932_s25 = sshll.u32 %s5088_s23, 4  ;;  %s4933_s25 = int_to_ptr.vmem [resolvable:$false] %s4932_s25 }
 0x42b   : > { %s4934_s11 = scalar_lea.vmem %s4933_s25, 3072  ;;  %p4935_p0 = scmp.lt.s32.totalorder %s5617_s26, %s4933_s25 }
 0x42c   : > { %p4936_p5 = scmp.lt.s32.totalorder %s4934_s11, %s4928_s18 }
 0x42d   : > { %4087 = vmatpush3.bf16.msra.mxu1 %v4710_v62 }
 0x42e   : > { %4088 = vmatprep.subr.bf16.mxu1 %v4711_v1  ;;  %p4937_p7 = por %p4936_p5, %p4935_p0 }
 0x430   : > { %p4938_p8 = pnand %p4937_p7, %p4931_p9 }
 0x431   : > { %4089 = vmatpush3.bf16.msra.mxu1 %v4712_v2 }
 0x432   : > { %4090 = vmatprep.subr.bf16.mxu1 %v4713_v3 }
 0x435   : > { %4091 = vmatpush3.bf16.msra.mxu1 %v4714_v4  ;;  %v4124_v6 = vpop.f32.mrb[24].mxu0 }
 0x436   : > { %v4125_v9 = vpop.f32.mrb[25].mxu0  ;;  %4092 = vmatprep.subr.bf16.mxu1 %v4715_v5 }
 0x437   : > { %v5602_v11 = vadd.f32 %v4125_v9, %v4124_v6  ;;  %v4127_v12 = vpop.f32.mrb[26].mxu0 }
 0x438   : > { %v4128_v28 = vpop.f32.mrb[27].mxu0 }
 0x439   : > { %4093 = vmatpush3.bf16.msra.mxu1 %v4716_v8  ;;  %v5604_v13 = vadd.f32 %v4128_v28, %v4127_v12 }
 0x43a   : > { %4094 = vmatprep.subr.bf16.mxu1 %v4717_v10 }
 0x43d   : > { %4095 = vmatpush3.bf16.msra.mxu1 %v4718_v41  ;;  %v4130_v30 = vpop.f32.mrb[28].mxu0 }
 0x43e   : > { %v4131_v15 = vpop.f32.mrb[29].mxu0  ;;  %4146 = vmatprep.subr.bf16.mxu1 %v4719_v14 }
 0x43f   : > { %v5606_v44 = vadd.f32 %v4131_v15, %v4130_v30  ;;  %v4133_v16 = vpop.f32.mrb[30].mxu0 }
 0x440   : > { %3043 = vmatmul.mubr.bf16.vlgmr.msra.gmra.mrb[40].mxu1 %v5600_v21  ;;  %v4134_v17 = vpop.f32.mrb[31].mxu0  ;;  %v4725_v21 = vld [vmem:[#allocation13 + $0xa8] sm:$0xff]  }
 0x441   : > { %3050 = vmatprep.mubr.bf16.mxu1 %v2697_v60  ;;  %v5609_v18 = vadd.f32 %v4134_v17, %v4133_v16  ;;  %4147 = vmatpush3.bf16.msra.mxu1 %v4719_v14 }
 0x442   : > { %4148 = vmatprep.subr.bf16.mxu1 %v4720_v27 }
 0x445   : > { %4149 = vmatpush3.bf16.msra.mxu1 %v4720_v27 }
 0x446   : > { %4150 = vmatprep.subr.bf16.mxu1 %v4721_v19 }
 0x448   : > { %3051 = vmatmul.mubr.bf16.gmra.mrb[44].mxu1 %v2696_v22 }
 0x449   : > { %4151 = vmatpush3.bf16.msra.mxu1 %v4721_v19  ;;  %4162 = vmatprep.mubr.bf16.mxu1 %v3105_v25 }
 0x44a   : > { %4152 = vmatprep.subr.bf16.mxu1 %v4723_v24 }
 0x44d   : > { %4153 = vmatpush3.bf16.msra.mxu1 %v4723_v24 }
 0x44e   : > { %4154 = vmatprep.subr.bf16.mxu1 %v4724_v29 }
 0x451   : > { %4155 = vmatpush3.bf16.msra.mxu1 %v4724_v29 }
 0x452   : > { %4156 = vmatprep.subr.bf16.mxu1 %v4725_v21 }
 0x455   : > { %4157 = vmatpush3.bf16.msra.mxu1 %v4725_v21 }
 0x456   : > { %4158 = vmatprep.subr.bf16.mxu1 %v4726_v31 }
 0x459   : > { %4159 = vmatpush3.bf16.msra.mxu1 %v4726_v31 }
 0x45a   : > { %4160 = vmatprep.subr.bf16.mxu1 %v4727_v26 }
 0x45d   : > { %4161 = vmatpush3.bf16.msra.mxu1 %v4727_v26 }
 0x460   : > { %4163 = vmatmul.mubr.bf16.vlgmr.msra.gmra.mrb[48].mxu1 %v3108_v32 }
 0x461   : > { %4941 = shalt.err (!%p4938_p8)
}
 0x462   : > { %s4942_s7 = scalar_lea.hbm %s5622_s20, 1536  ;;  %s4946_s24 = scalar_lea.hbm %s5817_s8, 3072 }
 0x463   : > { %p4943_p4 = scmp.ne.s32.totalorder %s5622_s20, %s4942_s7  ;;  %p4947_p1 = scmp.lt.u32.totalorder %s5622_s20, %s5817_s8 }
 0x464   : > { %p4948_p11 = scmp.lt.u32.totalorder %s4946_s24, %s4942_s7  ;;  %p4950_p2 = scmp.lt.u32.totalorder %s4942_s7, %s5622_s20 }
 0x465   : > { %p4944_p3 = pnand %p4943_p4, %p5818_p13 }
 0x466   : > { %p4949_p12 = por %p4948_p11, %p4947_p1 }
 0x467   : > { %p4945_p10 = pneg %p4944_p3 }
 0x468   : > { %p4951_p6 = por %p4950_p2, %p4949_p12 }
 0x46a   : > { %p4952_p9 = pnand %p4951_p6, %p4945_p10 }
 0x46c   : > { %4955 = shalt.err (!%p4952_p9)
}
 0x46d   : > { %s5089_s17 = smov 384   ;;  %s5090_s13 = smov 24  }
 0x46e   : > { %4243 = dma.vmem_to_hbm [thread:$0]  (%p5818_p13), %s5617_s26, 1536, %s5622_s20, %s3411_s9, %s5089_s17, %s5089_s17, %s5090_s13  }
 0x46f   : > { %s5819_s25 = sld [smem:[#allocation31_spill]]  ;;  %s609_s12 = scalar_lea.vmem [#allocation15], %s5459_s28 }
 0x470   : > { %s3451_s26 = sshll.u32 %s609_s12, 4  ;;  %s3994_s20 = sshll.u32 %s5191_s19, 9  ;;  %s5653_s26 = int_to_ptr.vmem [resolvable:$true] %s3451_s26 }
 0x471   : > { %s5820_s7 = sld [smem:[#allocation35_spill]]  ;;  %s5664_s27 = scalar_lea.sflag [#allocation16], %s533_s6 }
 0x472   : > { %s4956_s24 = scalar_lea.vmem %s5653_s26, 512  ;;  %s5091_s2 = smov [#allocation15]  }
 0x473   : > { %p4957_p0 = scmp.ne.s32.totalorder %s5653_s26, %s4956_s24  ;;  %s4960_s10 = sshll.u32 %s5091_s2, 4  ;;  %s4961_s10 = int_to_ptr.vmem [resolvable:$false] %s4960_s10 }
 0x474   : > { %s4962_s17 = scalar_lea.vmem %s4961_s10, 1024  ;;  %p4963_p8 = scmp.lt.s32.totalorder %s5653_s26, %s4961_s10 }
 0x475   : > { %v3918_v43 = vld [vmem:[%s5819_s25] ss:$0 sm:$0xff]  ;;  %p4958_p5 = pnand %p4957_p0, %p5818_p13  ;;  %p4964_p4 = scmp.lt.s32.totalorder %s4962_s17, %s4956_s24 }
 0x477   : > { %s5660_s0 = scalar_lea.hbm %s5820_s7, %s3994_s20  ;;  %p4959_p7 = pneg %p4958_p5 }
 0x478   : > { %p4965_p3 = por %p4964_p4, %p4963_p8 }
 0x47a   : > { %p4966_p10 = pnand %p4965_p3, %p4959_p7 }
 0x4f3   : > { %v4068_v7 = vpop.f32.mrb[32].mxu1 }
 0x4f4   : > { %v4069_v0 = vpop.f32.mrb[33].mxu1 }
 0x4f5   : > { %v4070_v33 = vadd.f32 %v4069_v0, %v4068_v7  ;;  %v4071_v34 = vpop.f32.mrb[34].mxu1 }
 0x4f6   : > { %v4072_v35 = vpop.f32.mrb[35].mxu1 }
 0x4f7   : > { %v4073_v36 = vadd.f32 %v4072_v35, %v4071_v34  ;;  %v2996_v47 = vadd.f32 %v4070_v33, %v3918_v43 }
 0x4f9   : > { %v2999_v54 = vadd.f32 %v4073_v36, %v3918_v43 }
 0x4fb   : > { %v4074_v23 = vpop.f32.mrb[36].mxu1 }
 0x4fc   : > { %v4075_v37 = vpop.f32.mrb[37].mxu1 }
 0x4fd   : > { %v4076_v38 = vadd.f32 %v4075_v37, %v4074_v23  ;;  %v4077_v39 = vpop.f32.mrb[38].mxu1 }
 0x4fe   : > { %v4078_v40 = vpop.f32.mrb[39].mxu1 }
 0x4ff   : > { %v4079_v42 = vadd.f32 %v4078_v40, %v4077_v39  ;;  %v3004_v59 = vadd.f32 %v4076_v38, %v3918_v43 }
 0x501   : > { %v3007_v63 = vadd.f32 %v4079_v42, %v3918_v43 }
 0x513   : > { %v4096_v45 = vpop.f32.mrb[40].mxu1 }
 0x514   : > { %v4097_v46 = vpop.f32.mrb[41].mxu1 }
 0x515   : > { %v4098_v48 = vadd.f32 %v4097_v46, %v4096_v45  ;;  %v4099_v51 = vpop.f32.mrb[42].mxu1 }
 0x516   : > { %v4100_v53 = vpop.f32.mrb[43].mxu1 }
 0x517   : > { %v3045_v55 = vadd.f32 %v4098_v48, %v2996_v47  ;;  %v4101_v52 = vadd.f32 %v4100_v53, %v4099_v51 }
 0x519   : > { %3059 = vst [vmem:[%s609_s12] sm:$0xff] %v3045_v55  ;;  %v3048_v56 = vadd.f32 %v4101_v52, %v2999_v54 }
 0x51b   : > { %3060 = vst [vmem:[%s609_s12 + $0x8] sm:$0xff] %v3048_v56  ;;  %v4102_v58 = vpop.f32.mrb[44].mxu1 }
 0x51c   : > { %v4103_v57 = vpop.f32.mrb[45].mxu1 }
 0x51d   : > { %v4104_v22 = vadd.f32 %v4103_v57, %v4102_v58  ;;  %v4105_v50 = vpop.f32.mrb[46].mxu1 }
 0x51e   : > { %v4106_v60 = vpop.f32.mrb[47].mxu1 }
 0x51f   : > { %v3053_v49 = vadd.f32 %v4104_v22, %v3004_v59  ;;  %v4107_v62 = vadd.f32 %v4106_v60, %v4105_v50 }
 0x521   : > { %3061 = vst [vmem:[%s609_s12 + $0x10] sm:$0xff] %v3053_v49  ;;  %v3056_v1 = vadd.f32 %v4107_v62, %v3007_v63 }
 0x523   : > { %3062 = vst [vmem:[%s609_s12 + $0x18] sm:$0xff] %v3056_v1 }
 0x524   : > { %4969 = shalt.err (!%p4966_p10)
}
 0x525   : > { %s4970_s6 = scalar_lea.hbm %s5660_s0, 512  ;;  %s4974_s23 = scalar_lea.hbm %s5820_s7, 1024 }
 0x526   : > { %p4971_p1 = scmp.ne.s32.totalorder %s5660_s0, %s4970_s6  ;;  %p4975_p2 = scmp.lt.u32.totalorder %s5660_s0, %s5820_s7 }
 0x527   : > { %p4976_p6 = scmp.lt.u32.totalorder %s4974_s23, %s4970_s6  ;;  %p4978_p0 = scmp.lt.u32.totalorder %s4970_s6, %s5660_s0 }
 0x528   : > { %p4972_p11 = pnand %p4971_p1, %p5818_p13 }
 0x529   : > { %p4977_p9 = por %p4976_p6, %p4975_p2 }
 0x52a   : > { %p4973_p12 = pneg %p4972_p11 }
 0x52b   : > { %p4979_p5 = por %p4978_p0, %p4977_p9 }
 0x52d   : > { %p4980_p7 = pnand %p4979_p5, %p4973_p12 }
 0x52f   : > { %4983 = shalt.err (!%p4980_p7)
}
 0x530   : > { %s5092_s9 = smov 128   ;;  %s5093_s11 = smov 8  }
 0x531   : > { %4244 = dma.vmem_to_hbm [thread:$0]  (%p5818_p13), %s5653_s26, 512, %s5660_s0, %s5664_s27, %s5092_s9, %s5092_s9, %s5093_s11  }
 0x532   : > { %s5821_s10 = sld [smem:[#allocation33_spill]]  ;;  %s616_s17 = scalar_lea.vmem [#allocation17], %s5459_s28 }
 0x533   : > { %v4164_v4 = vpop.f32.mrb[48].mxu1  ;;  %s3467_s6 = sshll.u32 %s616_s17, 4  ;;  %s5822_s0 = sld [smem:[#allocation36_spill]]  ;;  %s5699_s6 = int_to_ptr.vmem [resolvable:$true] %s3467_s6 }
 0x534   : > { %v3391_v8 = vpop.f32.mrb[49].mxu1  ;;  %s4984_s18 = scalar_lea.vmem %s5699_s6, 512  ;;  %s5094_s23 = smov [#allocation17]  }
 0x535   : > { %v4165_v12 = vpop.f32.mrb[50].mxu1  ;;  %p4985_p8 = scmp.ne.s32.totalorder %s5699_s6, %s4984_s18  ;;  %s4988_s25 = sshll.u32 %s5094_s23, 4  ;;  %s4989_s25 = int_to_ptr.vmem [resolvable:$false] %s4988_s25 }
 0x536   : > { %v3394_v14 = vpop.f32.mrb[51].mxu1  ;;  %s4990_s12 = scalar_lea.vmem %s4989_s25, 1024  ;;  %p4991_p10 = scmp.lt.s32.totalorder %s5699_s6, %s4989_s25 }
 0x537   : > { %p4986_p4 = pnand %p4985_p8, %p5818_p13  ;;  %p4992_p1 = scmp.lt.s32.totalorder %s4990_s12, %s4984_s18 }
 0x538   : > { %v3957_v2 = vld [vmem:[%s5821_s10] ss:$0 sm:$0xff] }
 0x539   : > { %v3351_v3 = vadd.f32 %v5606_v44, %v3957_v2  ;;  %v3343_v5 = vadd.f32 %v5602_v11, %v3957_v2  ;;  %v3354_v9 = vadd.f32 %v5609_v18, %v3957_v2  ;;  %v3346_v28 = vadd.f32 %v5604_v13, %v3957_v2  ;;  %s5706_s13 = scalar_lea.hbm %s5822_s0, %s3994_s20  ;;  %p4987_p3 = pneg %p4986_p4 }
 0x53a   : > { %p4993_p11 = por %p4992_p1, %p4991_p10 }
 0x53b   : > { %v3400_v6 = vadd.f32 %v4164_v4, %v3351_v3  ;;  %v3392_v10 = vadd.f32 %v3391_v8, %v3343_v5  ;;  %v3403_v41 = vadd.f32 %v4165_v12, %v3354_v9  ;;  %v3395_v11 = vadd.f32 %v3394_v14, %v3346_v28 }
 0x53c   : > { %p4994_p12 = pnand %p4993_p11, %p4987_p3 }
 0x53d   : > { %3408 = vst [vmem:[%s616_s17 + $0x10] sm:$0xff] %v3400_v6  ;;  %3406 = vst [vmem:[%s616_s17] sm:$0xff] %v3392_v10 }
 0x53e   : > { %3409 = vst [vmem:[%s616_s17 + $0x18] sm:$0xff] %v3403_v41  ;;  %3407 = vst [vmem:[%s616_s17 + $0x8] sm:$0xff] %v3395_v11 }
 0x53f   : > { %4997 = shalt.err (!%p4994_p12)
}
 0x540   : > { %s4998_s19 = scalar_lea.hbm %s5706_s13, 512  ;;  %s5002_s2 = scalar_lea.hbm %s5822_s0, 1024 }
 0x541   : > { %p4999_p2 = scmp.ne.s32.totalorder %s5706_s13, %s4998_s19  ;;  %p5003_p0 = scmp.lt.u32.totalorder %s5706_s13, %s5822_s0 }
 0x542   : > { %p5004_p5 = scmp.lt.u32.totalorder %s5002_s2, %s4998_s19  ;;  %p5006_p8 = scmp.lt.u32.totalorder %s4998_s19, %s5706_s13 }
 0x543   : > { %p5000_p6 = pnand %p4999_p2, %p5818_p13 }
 0x544   : > { %p5005_p7 = por %p5004_p5, %p5003_p0 }
 0x545   : > { %p5001_p9 = pneg %p5000_p6 }
 0x546   : > { %p5007_p4 = por %p5006_p8, %p5005_p7 }
 0x548   : > { %p5008_p3 = pnand %p5007_p4, %p5001_p9 }
 0x54a   : > { %5011 = shalt.err (!%p5008_p3)
}
 0x54b   : > { %4245 = dma.vmem_to_hbm [thread:$0]  (%p5818_p13), %s5699_s6, 512, %s5706_s13, %s5664_s27, %s5092_s9, %s5092_s9, %s5093_s11  }
 0x54c PF: > { %s3482_s28 = sand.u32 1, %s5058_s29   ;;  %p5823_p10 = scmp.ne.s32.totalorder %s5804_s14, 0 }
 0x54d   : > { %p5824_p1 = scmp.ge.s32.totalorder %s5070_s16, 2  ;;  %s3483_s26 = scalar_lea.sflag [#allocation4], %s3482_s28 }
 0x54f   : > { %p4273_p11 = pnand %p5824_p1, %p5823_p10 }
 0x551   : > { %5049 = dma.done.wait (!%p4273_p11), %s3483_s26, 1536  }
 0x552   : > { %5051 = vsyncadd (!%p4273_p11), %s3483_s26, 4294965760  ;;  %s5825_s22 = sadd.s32 4294967294, %s5070_s16  }
 0x553   : > { %s3491_s18 = sand.u32 1, %s5825_s22  }
 0x554   : > { %s3492_s23 = scalar_lea.sflag [#allocation16], %s3491_s18 }
 0x555   : > { %5053 = dma.done.wait (!%p4273_p11), %s3492_s23, 1024  }
 0x556   : > { %5055 = vsyncadd (!%p4273_p11), %s3492_s23, 4294966272  ;;  %p36_p13 = scmp.ge.s32.totalorder %s5339_s21, 4   ;;  %s5826_s29 = smov %s5062_s30 }
 0x557   : > { %s5827_s30 = smov %s5066_s15  ;;  %s5828_s15 = smov %s5351_s4 }
 0x558   : > { %s5829_s16 = smov %s5339_s21  ;;  %38 = sbr.rel (!%p36_p13) target bundleno = 24 (0x18), region = 178 }
 0x55f   :  { %3506 = vsyncpa [#allocation3], 1 }
 0x560   :  { %3508 = vsyncpa [#allocation3 + $0x1], 1 }
 0x561   :  { %3509 = vsyncpa [#allocation6], 1 }
 0x562   :  { %3511 = vsyncpa [#allocation6 + $0x1], 1 }
 0x563   :  { %3512 = vsyncpa [#allocation9], 1 }
 0x564   :  { %3513 = vsyncpa [#allocation12], 1 }
 0x565   :  { %3514 = vsyncpa [#allocation4], 1 }
 0x566   :  { %3516 = vsyncpa [#allocation4 + $0x1], 1 }
 0x567   :  { %3517 = vsyncpa [#allocation16], 1 }
 0x568   :  { %3519 = vsyncpa [#allocation16 + $0x1], 1 }

</bundles_post_ra>
